<compile_context>
chip_gen: v7x
topology: tpu7x:2x2x1
jax: 0.10.0
libtpu: 0.0.40
codegen_flags: <defaults>
</compile_context>

<pallas_src>
import numpy as np
import jax
import jax.numpy as jnp
from jax.experimental import pallas as pl
from jax.experimental.pallas import tpu as pltpu

VOCAB_LIMIT = 20000


def lstm_head_kernel(ids_ref,                 # SMEM (T,) int32 (scalar prefetch)
                     emb_hbm,                 # ANY/HBM (V, E) f32
                     state_ref,               # VMEM (2, H) f32: row0=h0, row1=c0
                     w_ref,                   # VMEM (E+H, 4H) bf16: [W_ih^T ; W_hh^T]
                     misc_ref,                # VMEM (H+2, 4H) f32: [W_out^T pad ; b ; b_out pad]
                     out_ref,                 # VMEM (1, >=128) f32 packed output
                     x_vmem, dma_sems):       # scratch: (T, E) f32, DMA sems (T,)
    T, E = x_vmem.shape
    H = state_ref.shape[1]

    # --- Fused embedding gather: T overlapped row DMAs HBM -> VMEM scratch. --
    copies = []
    for t in range(T):
        cp = pltpu.make_async_copy(
            emb_hbm.at[pl.ds(ids_ref[t], 1)],       # (1, E) row in HBM
            x_vmem.at[pl.ds(t, 1)],                 # (1, E) row in VMEM scratch
            dma_sems.at[t])
        cp.start()
        copies.append(cp)
    for cp in copies:
        cp.wait()

    wih = w_ref[0:E, :]                             # (E, 4H) bf16, i/f/o cols *0.5
    whh = w_ref[E:E + H, :]                         # (H, 4H) bf16, i/f/o cols *0.5
    b = misc_ref[H:H + 1, :]                        # (1, 4H) f32 folded bias (i/f/o *0.5)

    # --- Hoisted input projection (bf16 MXU operands, f32 accumulate). -------
    x_bf = x_vmem[...].astype(jnp.bfloat16)
    xw = jnp.dot(x_bf, wih, preferred_element_type=jnp.float32) + b   # (T, 4H)

    # --- Fully unrolled recurrence. One full-width tanh replaces sigmoid+tanh
    #     (sigmoid(x) = 0.5*tanh(x/2)+0.5; the /2 is folded into the weights).
    h = state_ref[0:1, :]                           # (1, H) f32
    c = state_ref[1:2, :]                           # (1, H) f32
    for t in range(T):
        gates = xw[t:t + 1, :] + jnp.dot(h.astype(jnp.bfloat16), whh,
                                         preferred_element_type=jnp.float32)
        tg = jnp.tanh(gates)                        # single EUP push for all 4 gates
        i_g = 0.5 * tg[:, 0 * H:1 * H] + 0.5
        f_g = 0.5 * tg[:, 1 * H:2 * H] + 0.5
        g_g = tg[:, 2 * H:3 * H]
        o_g = 0.5 * tg[:, 3 * H:4 * H] + 0.5
        c = f_g * c + i_g * g_g
        h = o_g * jnp.tanh(c)

    # --- Linear(H, 2) + softmax (f32, off the serial chain). ----------------
    logits_full = (jnp.dot(h, misc_ref[0:H, :], preferred_element_type=jnp.float32)
                   + misc_ref[H + 1:H + 2, :])      # (1, 4H), only lanes [0:2] valid
    logits = logits_full[:, 0:2]
    m = jnp.max(logits, axis=-1, keepdims=True)
    e = jnp.exp(logits - m)
    probs = e / jnp.sum(e, axis=-1, keepdims=True)

    # --- Single lane-dense packed output: probs @ [0:2], h @ [H:2H], c @ [2H:3H].
    out_ref[...] = jnp.zeros_like(out_ref)
    out_ref[:, 0:2] = probs
    out_ref[:, H:2 * H] = h
    out_ref[:, 2 * H:3 * H] = c


def prepare_params(params):
    """One-time glue (init time, not per call): transpose weights, fold the two
    LSTM biases, pre-scale i/f/o gate columns by 0.5 (tanh-only gating), cast
    the recurrence weights to bf16, and pack everything into 3 slabs."""
    f32 = jnp.float32
    H = params["w_hh"].shape[1]
    lanes = 4 * H

    wih_t = jnp.transpose(params["w_ih"]).astype(f32)                 # (E, 4H)
    whh_t = jnp.transpose(params["w_hh"]).astype(f32)                 # (H, 4H)
    b = (params["b_ih"] + params["b_hh"]).reshape(1, -1).astype(f32)  # (1, 4H)

    # sigmoid(x) == 0.5 * tanh(x/2) + 0.5  ->  scale ONLY i/f/o columns by 0.5.
    gate_scale = jnp.concatenate(
        [jnp.full((1, H), 0.5, f32), jnp.full((1, H), 0.5, f32),
         jnp.ones((1, H), f32), jnp.full((1, H), 0.5, f32)], axis=1)  # (1, 4H)
    wih_t = wih_t * gate_scale
    whh_t = whh_t * gate_scale
    b = b * gate_scale

    # bf16 MXU-operand slab (0.5 scaling is exact in bf16).
    w_slab = jnp.concatenate([wih_t, whh_t], axis=0).astype(jnp.bfloat16)  # (E+H, 4H)

    # f32 misc slab: rows [0:H] = W_out^T lane-padded, row H = folded bias,
    # row H+1 = b_out lane-padded.
    wout_t = jnp.transpose(params["w_out"]).astype(f32)               # (H, 2)
    wout_pad = jnp.concatenate(
        [wout_t, jnp.zeros((H, lanes - wout_t.shape[1]), f32)], axis=1)
    bout_pad = jnp.concatenate(
        [params["b_out"].reshape(1, -1).astype(f32),
         jnp.zeros((1, lanes - 2), f32)], axis=1)
    misc = jnp.concatenate([wout_pad, b, bout_pad], axis=0)           # (H+2, 4H)

    return {
        "embedding": params["embedding"].astype(f32),                 # (V, E) f32
        "w_slab": w_slab,
        "misc": misc,
    }


@jax.jit
def model_forward_pallas(inputs, hidden, prepped):
    """inputs: int32 (T,) token ids; hidden: (h0, c0) each (1, 1, H)."""
    w_slab = prepped["w_slab"]
    eh, four_h = w_slab.shape
    H = four_h // 4
    E = eh - H
    T = inputs.shape[0]

    ids = inputs.astype(jnp.int32)
    state = jnp.concatenate(
        [hidden[0].reshape(1, H), hidden[1].reshape(1, H)], axis=0
    ).astype(jnp.float32)                                             # (2, H)

    out_w = max(128, ((3 * H + 127) // 128) * 128)                    # lane-dense slab

    vmem = pl.BlockSpec(memory_space=pltpu.MemorySpace.VMEM)
    grid_spec = pltpu.PrefetchScalarGridSpec(
        num_scalar_prefetch=1,
        grid=(),
        in_specs=[
            pl.BlockSpec(memory_space=pl.ANY),       # embedding table stays in HBM
            vmem,                                    # state (2, H)
            vmem,                                    # bf16 weight slab
            vmem,                                    # f32 misc slab
        ],
        out_specs=vmem,
        scratch_shapes=[
            pltpu.VMEM((T, E), jnp.float32),         # gathered embeddings
            pltpu.SemaphoreType.DMA((T,)),           # one sem per row DMA
        ],
    )

    packed = pl.pallas_call(
        lstm_head_kernel,
        out_shape=jax.ShapeDtypeStruct((1, out_w), jnp.float32),
        grid_spec=grid_spec,
    )(ids, prepped["embedding"], state, w_slab, prepped["misc"])

    probs = packed[:, 0:2]
    h_n = packed[:, H:2 * H].reshape(1, 1, H)
    c_n = packed[:, 2 * H:3 * H].reshape(1, 1, H)
    # Match PyTorch return structure: (probs (1,2), (h_n (1,1,H), c_n (1,1,H)))
    return probs, (h_n, c_n)


def model_forward_ref(inputs, hidden, params):
    """Pure-JAX f32 reference identical to the PyTorch forward pass."""
    emb = params["embedding"]
    w_ih, w_hh = params["w_ih"], params["w_hh"]
    b_ih, b_hh = params["b_ih"], params["b_hh"]
    w_out, b_out = params["w_out"], params["b_out"]
    H = w_hh.shape[1]

    x = jnp.take(emb, inputs, axis=0)
    h = hidden[0].reshape(1, H)
    c = hidden[1].reshape(1, H)
    for t in range(x.shape[0]):
        gates = x[t:t + 1] @ w_ih.T + b_ih + h @ w_hh.T + b_hh
        i_g = jax.nn.sigmoid(gates[:, 0 * H:1 * H])
        f_g = jax.nn.sigmoid(gates[:, 1 * H:2 * H])
        g_g = jnp.tanh(gates[:, 2 * H:3 * H])
        o_g = jax.nn.sigmoid(gates[:, 3 * H:4 * H])
        c = f_g * c + i_g * g_g
        h = o_g * jnp.tanh(c)
    logits = h @ w_out.T + b_out
    probs = jax.nn.softmax(logits, axis=-1)
    return probs, (h.reshape(1, 1, H), c.reshape(1, 1, H))


def init_params(key, embedding_dim, hidden_dim):
    ks = jax.random.split(key, 7)
    k_emb = 1.0  # nn.Embedding default: N(0, 1)
    k_lstm = 1.0 / np.sqrt(hidden_dim)
    k_lin = 1.0 / np.sqrt(hidden_dim)
    return {
        "embedding": k_emb * jax.random.normal(
            ks[0], (VOCAB_LIMIT + 1, embedding_dim), jnp.float32),
        "w_ih": jax.random.uniform(ks[1], (4 * hidden_dim, embedding_dim),
                                   jnp.float32, -k_lstm, k_lstm),
        "w_hh": jax.random.uniform(ks[2], (4 * hidden_dim, hidden_dim),
                                   jnp.float32, -k_lstm, k_lstm),
        "b_ih": jax.random.uniform(ks[3], (4 * hidden_dim,),
                                   jnp.float32, -k_lstm, k_lstm),
        "b_hh": jax.random.uniform(ks[4], (4 * hidden_dim,),
                                   jnp.float32, -k_lstm, k_lstm),
        "w_out": jax.random.uniform(ks[5], (2, hidden_dim),
                                    jnp.float32, -k_lin, k_lin),
        "b_out": jax.random.uniform(ks[6], (2,),
                                    jnp.float32, -k_lin, k_lin),
    }


if __name__ == "__main__":
    embedding_dim = 32
    hidden_dim = 32
    seq_len = 8

    key = jax.random.PRNGKey(0)
    k_param, k_tok = jax.random.split(key)
    params = init_params(k_param, embedding_dim, hidden_dim)
    prepped = jax.tree_util.tree_map(jax.block_until_ready, prepare_params(params))

    inputs = jax.random.randint(k_tok, (seq_len,), 0, VOCAB_LIMIT + 1,
                                dtype=jnp.int32)
    hidden = (jnp.zeros((1, 1, hidden_dim), jnp.float32),
              jnp.zeros((1, 1, hidden_dim), jnp.float32))

    probs, (h_n, c_n) = model_forward_pallas(inputs, hidden, prepped)
    jax.block_until_ready((probs, h_n, c_n))

    probs_ref, (h_ref, c_ref) = model_forward_ref(inputs, hidden, params)
    # Tolerances loosened for bf16 MXU operands (review optimization #3).
    assert np.allclose(np.asarray(probs), np.asarray(probs_ref),
                       rtol=2e-2, atol=5e-3), "probs mismatch"
    assert np.allclose(np.asarray(h_n), np.asarray(h_ref),
                       rtol=2e-2, atol=5e-3), "h_n mismatch"
    assert np.allclose(np.asarray(c_n), np.asarray(c_ref),
                       rtol=2e-2, atol=5e-3), "c_n mismatch"

    print("KERNEL_OK")
</pallas_src>

<mosaic_0001>
module attributes {stable_mosaic.version = 11 : i64} {
  func.func @lstm_head_kernel(%arg0: memref<8xi32, #tpu.memory_space<smem>>, %arg1: memref<20001x32xf32, #tpu.memory_space<any>>, %arg2: memref<2x32xf32, #tpu.memory_space<vmem>>, %arg3: memref<64x128xbf16, #tpu.memory_space<vmem>>, %arg4: memref<34x128xf32, #tpu.memory_space<vmem>>, %arg5: memref<1x128xf32, #tpu.memory_space<vmem>>, %arg6: memref<8x32xf32, #tpu.memory_space<vmem>>, %arg7: memref<8x!tpu.dma_semaphore, #tpu.memory_space<semaphore_mem>>) attributes {dimension_semantics = [], scalar_prefetch = 1 : i64, scratch_operands = 2 : i64, tpu.core_type = #tpu.core_type<tc>} {
    %c0 = arith.constant 0 : index
    %0 = memref.load %arg0[%c0] : memref<8xi32, #tpu.memory_space<smem>>
    %c0_i32 = arith.constant 0 : i32
    %c0_i32_0 = arith.constant 0 : i32
    %1 = tpu.memref_slice %arg1[%0, %c0_i32_0] : memref<20001x32xf32, #tpu.memory_space<any>> -> memref<1x32xf32, #tpu.memory_space<any>>
    %c0_i32_1 = arith.constant 0 : i32
    %c0_i32_2 = arith.constant 0 : i32
    %2 = tpu.memref_slice %arg6[%c0_i32_1, %c0_i32_2] : memref<8x32xf32, #tpu.memory_space<vmem>> -> memref<1x32xf32, #tpu.memory_space<vmem>>
    %3 = tpu.memref_slice %arg7[%c0_i32] : memref<8x!tpu.dma_semaphore, #tpu.memory_space<semaphore_mem>> -> memref<1x!tpu.dma_semaphore, #tpu.memory_space<semaphore_mem>>
    %4 = tpu.memref_squeeze %3 : memref<1x!tpu.dma_semaphore, #tpu.memory_space<semaphore_mem>> -> memref<!tpu.dma_semaphore, #tpu.memory_space<semaphore_mem>>
    tpu.enqueue_dma source(%1 : memref<1x32xf32, #tpu.memory_space<any>>) target(%2 : memref<1x32xf32, #tpu.memory_space<vmem>>) target_semaphore(%4 : memref<!tpu.dma_semaphore, #tpu.memory_space<semaphore_mem>>)
    %c1 = arith.constant 1 : index
    %5 = memref.load %arg0[%c1] : memref<8xi32, #tpu.memory_space<smem>>
    %c1_i32 = arith.constant 1 : i32
    %c0_i32_3 = arith.constant 0 : i32
    %6 = tpu.memref_slice %arg1[%5, %c0_i32_3] : memref<20001x32xf32, #tpu.memory_space<any>> -> memref<1x32xf32, #tpu.memory_space<any>>
    %c1_i32_4 = arith.constant 1 : i32
    %c0_i32_5 = arith.constant 0 : i32
    %7 = tpu.memref_slice %arg6[%c1_i32_4, %c0_i32_5] : memref<8x32xf32, #tpu.memory_space<vmem>> -> memref<1x32xf32, #tpu.memory_space<vmem>>
    %8 = tpu.memref_slice %arg7[%c1_i32] : memref<8x!tpu.dma_semaphore, #tpu.memory_space<semaphore_mem>> -> memref<1x!tpu.dma_semaphore, #tpu.memory_space<semaphore_mem>>
    %9 = tpu.memref_squeeze %8 : memref<1x!tpu.dma_semaphore, #tpu.memory_space<semaphore_mem>> -> memref<!tpu.dma_semaphore, #tpu.memory_space<semaphore_mem>>
    tpu.enqueue_dma source(%6 : memref<1x32xf32, #tpu.memory_space<any>>) target(%7 : memref<1x32xf32, #tpu.memory_space<vmem>>) target_semaphore(%9 : memref<!tpu.dma_semaphore, #tpu.memory_space<semaphore_mem>>)
    %c2 = arith.constant 2 : index
    %10 = memref.load %arg0[%c2] : memref<8xi32, #tpu.memory_space<smem>>
    %c2_i32 = arith.constant 2 : i32
    %c0_i32_6 = arith.constant 0 : i32
    %11 = tpu.memref_slice %arg1[%10, %c0_i32_6] : memref<20001x32xf32, #tpu.memory_space<any>> -> memref<1x32xf32, #tpu.memory_space<any>>
    %c2_i32_7 = arith.constant 2 : i32
    %c0_i32_8 = arith.constant 0 : i32
    %12 = tpu.memref_slice %arg6[%c2_i32_7, %c0_i32_8] : memref<8x32xf32, #tpu.memory_space<vmem>> -> memref<1x32xf32, #tpu.memory_space<vmem>>
    %13 = tpu.memref_slice %arg7[%c2_i32] : memref<8x!tpu.dma_semaphore, #tpu.memory_space<semaphore_mem>> -> memref<1x!tpu.dma_semaphore, #tpu.memory_space<semaphore_mem>>
    %14 = tpu.memref_squeeze %13 : memref<1x!tpu.dma_semaphore, #tpu.memory_space<semaphore_mem>> -> memref<!tpu.dma_semaphore, #tpu.memory_space<semaphore_mem>>
    tpu.enqueue_dma source(%11 : memref<1x32xf32, #tpu.memory_space<any>>) target(%12 : memref<1x32xf32, #tpu.memory_space<vmem>>) target_semaphore(%14 : memref<!tpu.dma_semaphore, #tpu.memory_space<semaphore_mem>>)
    %c3 = arith.constant 3 : index
    %15 = memref.load %arg0[%c3] : memref<8xi32, #tpu.memory_space<smem>>
    %c3_i32 = arith.constant 3 : i32
    %c0_i32_9 = arith.constant 0 : i32
    %16 = tpu.memref_slice %arg1[%15, %c0_i32_9] : memref<20001x32xf32, #tpu.memory_space<any>> -> memref<1x32xf32, #tpu.memory_space<any>>
    %c3_i32_10 = arith.constant 3 : i32
    %c0_i32_11 = arith.constant 0 : i32
    %17 = tpu.memref_slice %arg6[%c3_i32_10, %c0_i32_11] : memref<8x32xf32, #tpu.memory_space<vmem>> -> memref<1x32xf32, #tpu.memory_space<vmem>>
    %18 = tpu.memref_slice %arg7[%c3_i32] : memref<8x!tpu.dma_semaphore, #tpu.memory_space<semaphore_mem>> -> memref<1x!tpu.dma_semaphore, #tpu.memory_space<semaphore_mem>>
    %19 = tpu.memref_squeeze %18 : memref<1x!tpu.dma_semaphore, #tpu.memory_space<semaphore_mem>> -> memref<!tpu.dma_semaphore, #tpu.memory_space<semaphore_mem>>
    tpu.enqueue_dma source(%16 : memref<1x32xf32, #tpu.memory_space<any>>) target(%17 : memref<1x32xf32, #tpu.memory_space<vmem>>) target_semaphore(%19 : memref<!tpu.dma_semaphore, #tpu.memory_space<semaphore_mem>>)
    %c4 = arith.constant 4 : index
    %20 = memref.load %arg0[%c4] : memref<8xi32, #tpu.memory_space<smem>>
    %c4_i32 = arith.constant 4 : i32
    %c0_i32_12 = arith.constant 0 : i32
    %21 = tpu.memref_slice %arg1[%20, %c0_i32_12] : memref<20001x32xf32, #tpu.memory_space<any>> -> memref<1x32xf32, #tpu.memory_space<any>>
    %c4_i32_13 = arith.constant 4 : i32
    %c0_i32_14 = arith.constant 0 : i32
    %22 = tpu.memref_slice %arg6[%c4_i32_13, %c0_i32_14] : memref<8x32xf32, #tpu.memory_space<vmem>> -> memref<1x32xf32, #tpu.memory_space<vmem>>
    %23 = tpu.memref_slice %arg7[%c4_i32] : memref<8x!tpu.dma_semaphore, #tpu.memory_space<semaphore_mem>> -> memref<1x!tpu.dma_semaphore, #tpu.memory_space<semaphore_mem>>
    %24 = tpu.memref_squeeze %23 : memref<1x!tpu.dma_semaphore, #tpu.memory_space<semaphore_mem>> -> memref<!tpu.dma_semaphore, #tpu.memory_space<semaphore_mem>>
    tpu.enqueue_dma source(%21 : memref<1x32xf32, #tpu.memory_space<any>>) target(%22 : memref<1x32xf32, #tpu.memory_space<vmem>>) target_semaphore(%24 : memref<!tpu.dma_semaphore, #tpu.memory_space<semaphore_mem>>)
    %c5 = arith.constant 5 : index
    %25 = memref.load %arg0[%c5] : memref<8xi32, #tpu.memory_space<smem>>
    %c5_i32 = arith.constant 5 : i32
    %c0_i32_15 = arith.constant 0 : i32
    %26 = tpu.memref_slice %arg1[%25, %c0_i32_15] : memref<20001x32xf32, #tpu.memory_space<any>> -> memref<1x32xf32, #tpu.memory_space<any>>
    %c5_i32_16 = arith.constant 5 : i32
    %c0_i32_17 = arith.constant 0 : i32
    %27 = tpu.memref_slice %arg6[%c5_i32_16, %c0_i32_17] : memref<8x32xf32, #tpu.memory_space<vmem>> -> memref<1x32xf32, #tpu.memory_space<vmem>>
    %28 = tpu.memref_slice %arg7[%c5_i32] : memref<8x!tpu.dma_semaphore, #tpu.memory_space<semaphore_mem>> -> memref<1x!tpu.dma_semaphore, #tpu.memory_space<semaphore_mem>>
    %29 = tpu.memref_squeeze %28 : memref<1x!tpu.dma_semaphore, #tpu.memory_space<semaphore_mem>> -> memref<!tpu.dma_semaphore, #tpu.memory_space<semaphore_mem>>
    tpu.enqueue_dma source(%26 : memref<1x32xf32, #tpu.memory_space<any>>) target(%27 : memref<1x32xf32, #tpu.memory_space<vmem>>) target_semaphore(%29 : memref<!tpu.dma_semaphore, #tpu.memory_space<semaphore_mem>>)
    %c6 = arith.constant 6 : index
    %30 = memref.load %arg0[%c6] : memref<8xi32, #tpu.memory_space<smem>>
    %c6_i32 = arith.constant 6 : i32
    %c0_i32_18 = arith.constant 0 : i32
    %31 = tpu.memref_slice %arg1[%30, %c0_i32_18] : memref<20001x32xf32, #tpu.memory_space<any>> -> memref<1x32xf32, #tpu.memory_space<any>>
    %c6_i32_19 = arith.constant 6 : i32
    %c0_i32_20 = arith.constant 0 : i32
    %32 = tpu.memref_slice %arg6[%c6_i32_19, %c0_i32_20] : memref<8x32xf32, #tpu.memory_space<vmem>> -> memref<1x32xf32, #tpu.memory_space<vmem>>
    %33 = tpu.memref_slice %arg7[%c6_i32] : memref<8x!tpu.dma_semaphore, #tpu.memory_space<semaphore_mem>> -> memref<1x!tpu.dma_semaphore, #tpu.memory_space<semaphore_mem>>
    %34 = tpu.memref_squeeze %33 : memref<1x!tpu.dma_semaphore, #tpu.memory_space<semaphore_mem>> -> memref<!tpu.dma_semaphore, #tpu.memory_space<semaphore_mem>>
    tpu.enqueue_dma source(%31 : memref<1x32xf32, #tpu.memory_space<any>>) target(%32 : memref<1x32xf32, #tpu.memory_space<vmem>>) target_semaphore(%34 : memref<!tpu.dma_semaphore, #tpu.memory_space<semaphore_mem>>)
    %c7 = arith.constant 7 : index
    %35 = memref.load %arg0[%c7] : memref<8xi32, #tpu.memory_space<smem>>
    %c7_i32 = arith.constant 7 : i32
    %c0_i32_21 = arith.constant 0 : i32
    %36 = tpu.memref_slice %arg1[%35, %c0_i32_21] : memref<20001x32xf32, #tpu.memory_space<any>> -> memref<1x32xf32, #tpu.memory_space<any>>
    %c7_i32_22 = arith.constant 7 : i32
    %c0_i32_23 = arith.constant 0 : i32
    %37 = tpu.memref_slice %arg6[%c7_i32_22, %c0_i32_23] : memref<8x32xf32, #tpu.memory_space<vmem>> -> memref<1x32xf32, #tpu.memory_space<vmem>>
    %38 = tpu.memref_slice %arg7[%c7_i32] : memref<8x!tpu.dma_semaphore, #tpu.memory_space<semaphore_mem>> -> memref<1x!tpu.dma_semaphore, #tpu.memory_space<semaphore_mem>>
    %39 = tpu.memref_squeeze %38 : memref<1x!tpu.dma_semaphore, #tpu.memory_space<semaphore_mem>> -> memref<!tpu.dma_semaphore, #tpu.memory_space<semaphore_mem>>
    tpu.enqueue_dma source(%36 : memref<1x32xf32, #tpu.memory_space<any>>) target(%37 : memref<1x32xf32, #tpu.memory_space<vmem>>) target_semaphore(%39 : memref<!tpu.dma_semaphore, #tpu.memory_space<semaphore_mem>>)
    %c0_i32_24 = arith.constant 0 : i32
    %c0_i32_25 = arith.constant 0 : i32
    %40 = tpu.memref_slice %arg1[%0, %c0_i32_25] : memref<20001x32xf32, #tpu.memory_space<any>> -> memref<1x32xf32, #tpu.memory_space<any>>
    %c0_i32_26 = arith.constant 0 : i32
    %c0_i32_27 = arith.constant 0 : i32
    %41 = tpu.memref_slice %arg6[%c0_i32_26, %c0_i32_27] : memref<8x32xf32, #tpu.memory_space<vmem>> -> memref<1x32xf32, #tpu.memory_space<vmem>>
    %42 = tpu.memref_slice %arg7[%c0_i32_24] : memref<8x!tpu.dma_semaphore, #tpu.memory_space<semaphore_mem>> -> memref<1x!tpu.dma_semaphore, #tpu.memory_space<semaphore_mem>>
    %43 = tpu.memref_squeeze %42 : memref<1x!tpu.dma_semaphore, #tpu.memory_space<semaphore_mem>> -> memref<!tpu.dma_semaphore, #tpu.memory_space<semaphore_mem>>
    tpu.wait_dma2 semaphore(%43 : memref<!tpu.dma_semaphore, #tpu.memory_space<semaphore_mem>>) src(%40 : memref<1x32xf32, #tpu.memory_space<any>>) dst(%41 : memref<1x32xf32, #tpu.memory_space<vmem>>)
    %c1_i32_28 = arith.constant 1 : i32
    %c0_i32_29 = arith.constant 0 : i32
    %44 = tpu.memref_slice %arg1[%5, %c0_i32_29] : memref<20001x32xf32, #tpu.memory_space<any>> -> memref<1x32xf32, #tpu.memory_space<any>>
    %c1_i32_30 = arith.constant 1 : i32
    %c0_i32_31 = arith.constant 0 : i32
    %45 = tpu.memref_slice %arg6[%c1_i32_30, %c0_i32_31] : memref<8x32xf32, #tpu.memory_space<vmem>> -> memref<1x32xf32, #tpu.memory_space<vmem>>
    %46 = tpu.memref_slice %arg7[%c1_i32_28] : memref<8x!tpu.dma_semaphore, #tpu.memory_space<semaphore_mem>> -> memref<1x!tpu.dma_semaphore, #tpu.memory_space<semaphore_mem>>
    %47 = tpu.memref_squeeze %46 : memref<1x!tpu.dma_semaphore, #tpu.memory_space<semaphore_mem>> -> memref<!tpu.dma_semaphore, #tpu.memory_space<semaphore_mem>>
    tpu.wait_dma2 semaphore(%47 : memref<!tpu.dma_semaphore, #tpu.memory_space<semaphore_mem>>) src(%44 : memref<1x32xf32, #tpu.memory_space<any>>) dst(%45 : memref<1x32xf32, #tpu.memory_space<vmem>>)
    %c2_i32_32 = arith.constant 2 : i32
    %c0_i32_33 = arith.constant 0 : i32
    %48 = tpu.memref_slice %arg1[%10, %c0_i32_33] : memref<20001x32xf32, #tpu.memory_space<any>> -> memref<1x32xf32, #tpu.memory_space<any>>
    %c2_i32_34 = arith.constant 2 : i32
    %c0_i32_35 = arith.constant 0 : i32
    %49 = tpu.memref_slice %arg6[%c2_i32_34, %c0_i32_35] : memref<8x32xf32, #tpu.memory_space<vmem>> -> memref<1x32xf32, #tpu.memory_space<vmem>>
    %50 = tpu.memref_slice %arg7[%c2_i32_32] : memref<8x!tpu.dma_semaphore, #tpu.memory_space<semaphore_mem>> -> memref<1x!tpu.dma_semaphore, #tpu.memory_space<semaphore_mem>>
    %51 = tpu.memref_squeeze %50 : memref<1x!tpu.dma_semaphore, #tpu.memory_space<semaphore_mem>> -> memref<!tpu.dma_semaphore, #tpu.memory_space<semaphore_mem>>
    tpu.wait_dma2 semaphore(%51 : memref<!tpu.dma_semaphore, #tpu.memory_space<semaphore_mem>>) src(%48 : memref<1x32xf32, #tpu.memory_space<any>>) dst(%49 : memref<1x32xf32, #tpu.memory_space<vmem>>)
    %c3_i32_36 = arith.constant 3 : i32
    %c0_i32_37 = arith.constant 0 : i32
    %52 = tpu.memref_slice %arg1[%15, %c0_i32_37] : memref<20001x32xf32, #tpu.memory_space<any>> -> memref<1x32xf32, #tpu.memory_space<any>>
    %c3_i32_38 = arith.constant 3 : i32
    %c0_i32_39 = arith.constant 0 : i32
    %53 = tpu.memref_slice %arg6[%c3_i32_38, %c0_i32_39] : memref<8x32xf32, #tpu.memory_space<vmem>> -> memref<1x32xf32, #tpu.memory_space<vmem>>
    %54 = tpu.memref_slice %arg7[%c3_i32_36] : memref<8x!tpu.dma_semaphore, #tpu.memory_space<semaphore_mem>> -> memref<1x!tpu.dma_semaphore, #tpu.memory_space<semaphore_mem>>
    %55 = tpu.memref_squeeze %54 : memref<1x!tpu.dma_semaphore, #tpu.memory_space<semaphore_mem>> -> memref<!tpu.dma_semaphore, #tpu.memory_space<semaphore_mem>>
    tpu.wait_dma2 semaphore(%55 : memref<!tpu.dma_semaphore, #tpu.memory_space<semaphore_mem>>) src(%52 : memref<1x32xf32, #tpu.memory_space<any>>) dst(%53 : memref<1x32xf32, #tpu.memory_space<vmem>>)
    %c4_i32_40 = arith.constant 4 : i32
    %c0_i32_41 = arith.constant 0 : i32
    %56 = tpu.memref_slice %arg1[%20, %c0_i32_41] : memref<20001x32xf32, #tpu.memory_space<any>> -> memref<1x32xf32, #tpu.memory_space<any>>
    %c4_i32_42 = arith.constant 4 : i32
    %c0_i32_43 = arith.constant 0 : i32
    %57 = tpu.memref_slice %arg6[%c4_i32_42, %c0_i32_43] : memref<8x32xf32, #tpu.memory_space<vmem>> -> memref<1x32xf32, #tpu.memory_space<vmem>>
    %58 = tpu.memref_slice %arg7[%c4_i32_40] : memref<8x!tpu.dma_semaphore, #tpu.memory_space<semaphore_mem>> -> memref<1x!tpu.dma_semaphore, #tpu.memory_space<semaphore_mem>>
    %59 = tpu.memref_squeeze %58 : memref<1x!tpu.dma_semaphore, #tpu.memory_space<semaphore_mem>> -> memref<!tpu.dma_semaphore, #tpu.memory_space<semaphore_mem>>
    tpu.wait_dma2 semaphore(%59 : memref<!tpu.dma_semaphore, #tpu.memory_space<semaphore_mem>>) src(%56 : memref<1x32xf32, #tpu.memory_space<any>>) dst(%57 : memref<1x32xf32, #tpu.memory_space<vmem>>)
    %c5_i32_44 = arith.constant 5 : i32
    %c0_i32_45 = arith.constant 0 : i32
    %60 = tpu.memref_slice %arg1[%25, %c0_i32_45] : memref<20001x32xf32, #tpu.memory_space<any>> -> memref<1x32xf32, #tpu.memory_space<any>>
    %c5_i32_46 = arith.constant 5 : i32
    %c0_i32_47 = arith.constant 0 : i32
    %61 = tpu.memref_slice %arg6[%c5_i32_46, %c0_i32_47] : memref<8x32xf32, #tpu.memory_space<vmem>> -> memref<1x32xf32, #tpu.memory_space<vmem>>
    %62 = tpu.memref_slice %arg7[%c5_i32_44] : memref<8x!tpu.dma_semaphore, #tpu.memory_space<semaphore_mem>> -> memref<1x!tpu.dma_semaphore, #tpu.memory_space<semaphore_mem>>
    %63 = tpu.memref_squeeze %62 : memref<1x!tpu.dma_semaphore, #tpu.memory_space<semaphore_mem>> -> memref<!tpu.dma_semaphore, #tpu.memory_space<semaphore_mem>>
    tpu.wait_dma2 semaphore(%63 : memref<!tpu.dma_semaphore, #tpu.memory_space<semaphore_mem>>) src(%60 : memref<1x32xf32, #tpu.memory_space<any>>) dst(%61 : memref<1x32xf32, #tpu.memory_space<vmem>>)
    %c6_i32_48 = arith.constant 6 : i32
    %c0_i32_49 = arith.constant 0 : i32
    %64 = tpu.memref_slice %arg1[%30, %c0_i32_49] : memref<20001x32xf32, #tpu.memory_space<any>> -> memref<1x32xf32, #tpu.memory_space<any>>
    %c6_i32_50 = arith.constant 6 : i32
    %c0_i32_51 = arith.constant 0 : i32
    %65 = tpu.memref_slice %arg6[%c6_i32_50, %c0_i32_51] : memref<8x32xf32, #tpu.memory_space<vmem>> -> memref<1x32xf32, #tpu.memory_space<vmem>>
    %66 = tpu.memref_slice %arg7[%c6_i32_48] : memref<8x!tpu.dma_semaphore, #tpu.memory_space<semaphore_mem>> -> memref<1x!tpu.dma_semaphore, #tpu.memory_space<semaphore_mem>>
    %67 = tpu.memref_squeeze %66 : memref<1x!tpu.dma_semaphore, #tpu.memory_space<semaphore_mem>> -> memref<!tpu.dma_semaphore, #tpu.memory_space<semaphore_mem>>
    tpu.wait_dma2 semaphore(%67 : memref<!tpu.dma_semaphore, #tpu.memory_space<semaphore_mem>>) src(%64 : memref<1x32xf32, #tpu.memory_space<any>>) dst(%65 : memref<1x32xf32, #tpu.memory_space<vmem>>)
    %c7_i32_52 = arith.constant 7 : i32
    %c0_i32_53 = arith.constant 0 : i32
    %68 = tpu.memref_slice %arg1[%35, %c0_i32_53] : memref<20001x32xf32, #tpu.memory_space<any>> -> memref<1x32xf32, #tpu.memory_space<any>>
    %c7_i32_54 = arith.constant 7 : i32
    %c0_i32_55 = arith.constant 0 : i32
    %69 = tpu.memref_slice %arg6[%c7_i32_54, %c0_i32_55] : memref<8x32xf32, #tpu.memory_space<vmem>> -> memref<1x32xf32, #tpu.memory_space<vmem>>
    %70 = tpu.memref_slice %arg7[%c7_i32_52] : memref<8x!tpu.dma_semaphore, #tpu.memory_space<semaphore_mem>> -> memref<1x!tpu.dma_semaphore, #tpu.memory_space<semaphore_mem>>
    %71 = tpu.memref_squeeze %70 : memref<1x!tpu.dma_semaphore, #tpu.memory_space<semaphore_mem>> -> memref<!tpu.dma_semaphore, #tpu.memory_space<semaphore_mem>>
    tpu.wait_dma2 semaphore(%71 : memref<!tpu.dma_semaphore, #tpu.memory_space<semaphore_mem>>) src(%68 : memref<1x32xf32, #tpu.memory_space<any>>) dst(%69 : memref<1x32xf32, #tpu.memory_space<vmem>>)
    %c0_56 = arith.constant 0 : index
    %c0_57 = arith.constant 0 : index
    %72 = vector.load %arg3[%c0_56, %c0_57] : memref<64x128xbf16, #tpu.memory_space<vmem>>, vector<32x128xbf16>
    %c32 = arith.constant 32 : index
    %c0_58 = arith.constant 0 : index
    %73 = vector.load %arg3[%c32, %c0_58] : memref<64x128xbf16, #tpu.memory_space<vmem>>, vector<32x128xbf16>
    %c32_59 = arith.constant 32 : index
    %c0_60 = arith.constant 0 : index
    %74 = vector.load %arg4[%c32_59, %c0_60] : memref<34x128xf32, #tpu.memory_space<vmem>>, vector<1x128xf32>
    %c0_61 = arith.constant 0 : index
    %c0_62 = arith.constant 0 : index
    %75 = vector.load %arg6[%c0_61, %c0_62] : memref<8x32xf32, #tpu.memory_space<vmem>>, vector<8x32xf32>
    %76 = arith.truncf %75 : vector<8x32xf32> to vector<8x32xbf16>
    %cst = arith.constant dense<0.000000e+00> : vector<8x128xf32>
    %77 = tpu.matmul %76, %72, %cst {dimension_numbers = #tpu.dot_dimension_numbers<[1], [0], [0], [1], [0, 0, 1, 1], [], []>} : vector<8x32xbf16>, vector<32x128xbf16>, vector<8x128xf32> -> vector<8x128xf32>
    %78 = vector.broadcast %74 : vector<1x128xf32> to vector<8x128xf32>
    %79 = arith.addf %77, %78 : vector<8x128xf32>
    %c0_63 = arith.constant 0 : index
    %c0_64 = arith.constant 0 : index
    %80 = vector.load %arg2[%c0_63, %c0_64] : memref<2x32xf32, #tpu.memory_space<vmem>>, vector<1x32xf32>
    %c1_65 = arith.constant 1 : index
    %c0_66 = arith.constant 0 : index
    %81 = vector.load %arg2[%c1_65, %c0_66] : memref<2x32xf32, #tpu.memory_space<vmem>>, vector<1x32xf32>
    %82 = vector.extract_strided_slice %79 {offsets = [0, 0], sizes = [1, 128], strides = [1, 1]} : vector<8x128xf32> to vector<1x128xf32>
    %83 = arith.truncf %80 : vector<1x32xf32> to vector<1x32xbf16>
    %cst_67 = arith.constant dense<0.000000e+00> : vector<1x128xf32>
    %84 = tpu.matmul %83, %73, %cst_67 {dimension_numbers = #tpu.dot_dimension_numbers<[1], [0], [0], [1], [0, 0, 1, 1], [], []>} : vector<1x32xbf16>, vector<32x128xbf16>, vector<1x128xf32> -> vector<1x128xf32>
    %85 = arith.addf %82, %84 : vector<1x128xf32>
    %86 = math.tanh %85 : vector<1x128xf32>
    %87 = vector.extract_strided_slice %86 {offsets = [0, 0], sizes = [1, 32], strides = [1, 1]} : vector<1x128xf32> to vector<1x32xf32>
    %cst_68 = arith.constant 5.000000e-01 : f32
    %88 = vector.broadcast %cst_68 : f32 to vector<1x32xf32>
    %89 = arith.mulf %88, %87 : vector<1x32xf32>
    %cst_69 = arith.constant 5.000000e-01 : f32
    %90 = vector.broadcast %cst_69 : f32 to vector<1x32xf32>
    %91 = arith.addf %89, %90 : vector<1x32xf32>
    %92 = vector.extract_strided_slice %86 {offsets = [0, 32], sizes = [1, 32], strides = [1, 1]} : vector<1x128xf32> to vector<1x32xf32>
    %cst_70 = arith.constant 5.000000e-01 : f32
    %93 = vector.broadcast %cst_70 : f32 to vector<1x32xf32>
    %94 = arith.mulf %93, %92 : vector<1x32xf32>
    %cst_71 = arith.constant 5.000000e-01 : f32
    %95 = vector.broadcast %cst_71 : f32 to vector<1x32xf32>
    %96 = arith.addf %94, %95 : vector<1x32xf32>
    %97 = vector.extract_strided_slice %86 {offsets = [0, 64], sizes = [1, 32], strides = [1, 1]} : vector<1x128xf32> to vector<1x32xf32>
    %98 = vector.extract_strided_slice %86 {offsets = [0, 96], sizes = [1, 32], strides = [1, 1]} : vector<1x128xf32> to vector<1x32xf32>
    %cst_72 = arith.constant 5.000000e-01 : f32
    %99 = vector.broadcast %cst_72 : f32 to vector<1x32xf32>
    %100 = arith.mulf %99, %98 : vector<1x32xf32>
    %cst_73 = arith.constant 5.000000e-01 : f32
    %101 = vector.broadcast %cst_73 : f32 to vector<1x32xf32>
    %102 = arith.addf %100, %101 : vector<1x32xf32>
    %103 = arith.mulf %96, %81 : vector<1x32xf32>
    %104 = arith.mulf %91, %97 : vector<1x32xf32>
    %105 = arith.addf %103, %104 : vector<1x32xf32>
    %106 = math.tanh %105 : vector<1x32xf32>
    %107 = arith.mulf %102, %106 : vector<1x32xf32>
    %108 = vector.extract_strided_slice %79 {offsets = [1, 0], sizes = [1, 128], strides = [1, 1]} : vector<8x128xf32> to vector<1x128xf32>
    %109 = arith.truncf %107 : vector<1x32xf32> to vector<1x32xbf16>
    %cst_74 = arith.constant dense<0.000000e+00> : vector<1x128xf32>
    %110 = tpu.matmul %109, %73, %cst_74 {dimension_numbers = #tpu.dot_dimension_numbers<[1], [0], [0], [1], [0, 0, 1, 1], [], []>} : vector<1x32xbf16>, vector<32x128xbf16>, vector<1x128xf32> -> vector<1x128xf32>
    %111 = arith.addf %108, %110 : vector<1x128xf32>
    %112 = math.tanh %111 : vector<1x128xf32>
    %113 = vector.extract_strided_slice %112 {offsets = [0, 0], sizes = [1, 32], strides = [1, 1]} : vector<1x128xf32> to vector<1x32xf32>
    %cst_75 = arith.constant 5.000000e-01 : f32
    %114 = vector.broadcast %cst_75 : f32 to vector<1x32xf32>
    %115 = arith.mulf %114, %113 : vector<1x32xf32>
    %cst_76 = arith.constant 5.000000e-01 : f32
    %116 = vector.broadcast %cst_76 : f32 to vector<1x32xf32>
    %117 = arith.addf %115, %116 : vector<1x32xf32>
    %118 = vector.extract_strided_slice %112 {offsets = [0, 32], sizes = [1, 32], strides = [1, 1]} : vector<1x128xf32> to vector<1x32xf32>
    %cst_77 = arith.constant 5.000000e-01 : f32
    %119 = vector.broadcast %cst_77 : f32 to vector<1x32xf32>
    %120 = arith.mulf %119, %118 : vector<1x32xf32>
    %cst_78 = arith.constant 5.000000e-01 : f32
    %121 = vector.broadcast %cst_78 : f32 to vector<1x32xf32>
    %122 = arith.addf %120, %121 : vector<1x32xf32>
    %123 = vector.extract_strided_slice %112 {offsets = [0, 64], sizes = [1, 32], strides = [1, 1]} : vector<1x128xf32> to vector<1x32xf32>
    %124 = vector.extract_strided_slice %112 {offsets = [0, 96], sizes = [1, 32], strides = [1, 1]} : vector<1x128xf32> to vector<1x32xf32>
    %cst_79 = arith.constant 5.000000e-01 : f32
    %125 = vector.broadcast %cst_79 : f32 to vector<1x32xf32>
    %126 = arith.mulf %125, %124 : vector<1x32xf32>
    %cst_80 = arith.constant 5.000000e-01 : f32
    %127 = vector.broadcast %cst_80 : f32 to vector<1x32xf32>
    %128 = arith.addf %126, %127 : vector<1x32xf32>
    %129 = arith.mulf %122, %105 : vector<1x32xf32>
    %130 = arith.mulf %117, %123 : vector<1x32xf32>
    %131 = arith.addf %129, %130 : vector<1x32xf32>
    %132 = math.tanh %131 : vector<1x32xf32>
    %133 = arith.mulf %128, %132 : vector<1x32xf32>
    %134 = vector.extract_strided_slice %79 {offsets = [2, 0], sizes = [1, 128], strides = [1, 1]} : vector<8x128xf32> to vector<1x128xf32>
    %135 = arith.truncf %133 : vector<1x32xf32> to vector<1x32xbf16>
    %cst_81 = arith.constant dense<0.000000e+00> : vector<1x128xf32>
    %136 = tpu.matmul %135, %73, %cst_81 {dimension_numbers = #tpu.dot_dimension_numbers<[1], [0], [0], [1], [0, 0, 1, 1], [], []>} : vector<1x32xbf16>, vector<32x128xbf16>, vector<1x128xf32> -> vector<1x128xf32>
    %137 = arith.addf %134, %136 : vector<1x128xf32>
    %138 = math.tanh %137 : vector<1x128xf32>
    %139 = vector.extract_strided_slice %138 {offsets = [0, 0], sizes = [1, 32], strides = [1, 1]} : vector<1x128xf32> to vector<1x32xf32>
    %cst_82 = arith.constant 5.000000e-01 : f32
    %140 = vector.broadcast %cst_82 : f32 to vector<1x32xf32>
    %141 = arith.mulf %140, %139 : vector<1x32xf32>
    %cst_83 = arith.constant 5.000000e-01 : f32
    %142 = vector.broadcast %cst_83 : f32 to vector<1x32xf32>
    %143 = arith.addf %141, %142 : vector<1x32xf32>
    %144 = vector.extract_strided_slice %138 {offsets = [0, 32], sizes = [1, 32], strides = [1, 1]} : vector<1x128xf32> to vector<1x32xf32>
    %cst_84 = arith.constant 5.000000e-01 : f32
    %145 = vector.broadcast %cst_84 : f32 to vector<1x32xf32>
    %146 = arith.mulf %145, %144 : vector<1x32xf32>
    %cst_85 = arith.constant 5.000000e-01 : f32
    %147 = vector.broadcast %cst_85 : f32 to vector<1x32xf32>
    %148 = arith.addf %146, %147 : vector<1x32xf32>
    %149 = vector.extract_strided_slice %138 {offsets = [0, 64], sizes = [1, 32], strides = [1, 1]} : vector<1x128xf32> to vector<1x32xf32>
    %150 = vector.extract_strided_slice %138 {offsets = [0, 96], sizes = [1, 32], strides = [1, 1]} : vector<1x128xf32> to vector<1x32xf32>
    %cst_86 = arith.constant 5.000000e-01 : f32
    %151 = vector.broadcast %cst_86 : f32 to vector<1x32xf32>
    %152 = arith.mulf %151, %150 : vector<1x32xf32>
    %cst_87 = arith.constant 5.000000e-01 : f32
    %153 = vector.broadcast %cst_87 : f32 to vector<1x32xf32>
    %154 = arith.addf %152, %153 : vector<1x32xf32>
    %155 = arith.mulf %148, %131 : vector<1x32xf32>
    %156 = arith.mulf %143, %149 : vector<1x32xf32>
    %157 = arith.addf %155, %156 : vector<1x32xf32>
    %158 = math.tanh %157 : vector<1x32xf32>
    %159 = arith.mulf %154, %158 : vector<1x32xf32>
    %160 = vector.extract_strided_slice %79 {offsets = [3, 0], sizes = [1, 128], strides = [1, 1]} : vector<8x128xf32> to vector<1x128xf32>
    %161 = arith.truncf %159 : vector<1x32xf32> to vector<1x32xbf16>
    %cst_88 = arith.constant dense<0.000000e+00> : vector<1x128xf32>
    %162 = tpu.matmul %161, %73, %cst_88 {dimension_numbers = #tpu.dot_dimension_numbers<[1], [0], [0], [1], [0, 0, 1, 1], [], []>} : vector<1x32xbf16>, vector<32x128xbf16>, vector<1x128xf32> -> vector<1x128xf32>
    %163 = arith.addf %160, %162 : vector<1x128xf32>
    %164 = math.tanh %163 : vector<1x128xf32>
    %165 = vector.extract_strided_slice %164 {offsets = [0, 0], sizes = [1, 32], strides = [1, 1]} : vector<1x128xf32> to vector<1x32xf32>
    %cst_89 = arith.constant 5.000000e-01 : f32
    %166 = vector.broadcast %cst_89 : f32 to vector<1x32xf32>
    %167 = arith.mulf %166, %165 : vector<1x32xf32>
    %cst_90 = arith.constant 5.000000e-01 : f32
    %168 = vector.broadcast %cst_90 : f32 to vector<1x32xf32>
    %169 = arith.addf %167, %168 : vector<1x32xf32>
    %170 = vector.extract_strided_slice %164 {offsets = [0, 32], sizes = [1, 32], strides = [1, 1]} : vector<1x128xf32> to vector<1x32xf32>
    %cst_91 = arith.constant 5.000000e-01 : f32
    %171 = vector.broadcast %cst_91 : f32 to vector<1x32xf32>
    %172 = arith.mulf %171, %170 : vector<1x32xf32>
    %cst_92 = arith.constant 5.000000e-01 : f32
    %173 = vector.broadcast %cst_92 : f32 to vector<1x32xf32>
    %174 = arith.addf %172, %173 : vector<1x32xf32>
    %175 = vector.extract_strided_slice %164 {offsets = [0, 64], sizes = [1, 32], strides = [1, 1]} : vector<1x128xf32> to vector<1x32xf32>
    %176 = vector.extract_strided_slice %164 {offsets = [0, 96], sizes = [1, 32], strides = [1, 1]} : vector<1x128xf32> to vector<1x32xf32>
    %cst_93 = arith.constant 5.000000e-01 : f32
    %177 = vector.broadcast %cst_93 : f32 to vector<1x32xf32>
    %178 = arith.mulf %177, %176 : vector<1x32xf32>
    %cst_94 = arith.constant 5.000000e-01 : f32
    %179 = vector.broadcast %cst_94 : f32 to vector<1x32xf32>
    %180 = arith.addf %178, %179 : vector<1x32xf32>
    %181 = arith.mulf %174, %157 : vector<1x32xf32>
    %182 = arith.mulf %169, %175 : vector<1x32xf32>
    %183 = arith.addf %181, %182 : vector<1x32xf32>
    %184 = math.tanh %183 : vector<1x32xf32>
    %185 = arith.mulf %180, %184 : vector<1x32xf32>
    %186 = vector.extract_strided_slice %79 {offsets = [4, 0], sizes = [1, 128], strides = [1, 1]} : vector<8x128xf32> to vector<1x128xf32>
    %187 = arith.truncf %185 : vector<1x32xf32> to vector<1x32xbf16>
    %cst_95 = arith.constant dense<0.000000e+00> : vector<1x128xf32>
    %188 = tpu.matmul %187, %73, %cst_95 {dimension_numbers = #tpu.dot_dimension_numbers<[1], [0], [0], [1], [0, 0, 1, 1], [], []>} : vector<1x32xbf16>, vector<32x128xbf16>, vector<1x128xf32> -> vector<1x128xf32>
    %189 = arith.addf %186, %188 : vector<1x128xf32>
    %190 = math.tanh %189 : vector<1x128xf32>
    %191 = vector.extract_strided_slice %190 {offsets = [0, 0], sizes = [1, 32], strides = [1, 1]} : vector<1x128xf32> to vector<1x32xf32>
    %cst_96 = arith.constant 5.000000e-01 : f32
    %192 = vector.broadcast %cst_96 : f32 to vector<1x32xf32>
    %193 = arith.mulf %192, %191 : vector<1x32xf32>
    %cst_97 = arith.constant 5.000000e-01 : f32
    %194 = vector.broadcast %cst_97 : f32 to vector<1x32xf32>
    %195 = arith.addf %193, %194 : vector<1x32xf32>
    %196 = vector.extract_strided_slice %190 {offsets = [0, 32], sizes = [1, 32], strides = [1, 1]} : vector<1x128xf32> to vector<1x32xf32>
    %cst_98 = arith.constant 5.000000e-01 : f32
    %197 = vector.broadcast %cst_98 : f32 to vector<1x32xf32>
    %198 = arith.mulf %197, %196 : vector<1x32xf32>
    %cst_99 = arith.constant 5.000000e-01 : f32
    %199 = vector.broadcast %cst_99 : f32 to vector<1x32xf32>
    %200 = arith.addf %198, %199 : vector<1x32xf32>
    %201 = vector.extract_strided_slice %190 {offsets = [0, 64], sizes = [1, 32], strides = [1, 1]} : vector<1x128xf32> to vector<1x32xf32>
    %202 = vector.extract_strided_slice %190 {offsets = [0, 96], sizes = [1, 32], strides = [1, 1]} : vector<1x128xf32> to vector<1x32xf32>
    %cst_100 = arith.constant 5.000000e-01 : f32
    %203 = vector.broadcast %cst_100 : f32 to vector<1x32xf32>
    %204 = arith.mulf %203, %202 : vector<1x32xf32>
    %cst_101 = arith.constant 5.000000e-01 : f32
    %205 = vector.broadcast %cst_101 : f32 to vector<1x32xf32>
    %206 = arith.addf %204, %205 : vector<1x32xf32>
    %207 = arith.mulf %200, %183 : vector<1x32xf32>
    %208 = arith.mulf %195, %201 : vector<1x32xf32>
    %209 = arith.addf %207, %208 : vector<1x32xf32>
    %210 = math.tanh %209 : vector<1x32xf32>
    %211 = arith.mulf %206, %210 : vector<1x32xf32>
    %212 = vector.extract_strided_slice %79 {offsets = [5, 0], sizes = [1, 128], strides = [1, 1]} : vector<8x128xf32> to vector<1x128xf32>
    %213 = arith.truncf %211 : vector<1x32xf32> to vector<1x32xbf16>
    %cst_102 = arith.constant dense<0.000000e+00> : vector<1x128xf32>
    %214 = tpu.matmul %213, %73, %cst_102 {dimension_numbers = #tpu.dot_dimension_numbers<[1], [0], [0], [1], [0, 0, 1, 1], [], []>} : vector<1x32xbf16>, vector<32x128xbf16>, vector<1x128xf32> -> vector<1x128xf32>
    %215 = arith.addf %212, %214 : vector<1x128xf32>
    %216 = math.tanh %215 : vector<1x128xf32>
    %217 = vector.extract_strided_slice %216 {offsets = [0, 0], sizes = [1, 32], strides = [1, 1]} : vector<1x128xf32> to vector<1x32xf32>
    %cst_103 = arith.constant 5.000000e-01 : f32
    %218 = vector.broadcast %cst_103 : f32 to vector<1x32xf32>
    %219 = arith.mulf %218, %217 : vector<1x32xf32>
    %cst_104 = arith.constant 5.000000e-01 : f32
    %220 = vector.broadcast %cst_104 : f32 to vector<1x32xf32>
    %221 = arith.addf %219, %220 : vector<1x32xf32>
    %222 = vector.extract_strided_slice %216 {offsets = [0, 32], sizes = [1, 32], strides = [1, 1]} : vector<1x128xf32> to vector<1x32xf32>
    %cst_105 = arith.constant 5.000000e-01 : f32
    %223 = vector.broadcast %cst_105 : f32 to vector<1x32xf32>
    %224 = arith.mulf %223, %222 : vector<1x32xf32>
    %cst_106 = arith.constant 5.000000e-01 : f32
    %225 = vector.broadcast %cst_106 : f32 to vector<1x32xf32>
    %226 = arith.addf %224, %225 : vector<1x32xf32>
    %227 = vector.extract_strided_slice %216 {offsets = [0, 64], sizes = [1, 32], strides = [1, 1]} : vector<1x128xf32> to vector<1x32xf32>
    %228 = vector.extract_strided_slice %216 {offsets = [0, 96], sizes = [1, 32], strides = [1, 1]} : vector<1x128xf32> to vector<1x32xf32>
    %cst_107 = arith.constant 5.000000e-01 : f32
    %229 = vector.broadcast %cst_107 : f32 to vector<1x32xf32>
    %230 = arith.mulf %229, %228 : vector<1x32xf32>
    %cst_108 = arith.constant 5.000000e-01 : f32
    %231 = vector.broadcast %cst_108 : f32 to vector<1x32xf32>
    %232 = arith.addf %230, %231 : vector<1x32xf32>
    %233 = arith.mulf %226, %209 : vector<1x32xf32>
    %234 = arith.mulf %221, %227 : vector<1x32xf32>
    %235 = arith.addf %233, %234 : vector<1x32xf32>
    %236 = math.tanh %235 : vector<1x32xf32>
    %237 = arith.mulf %232, %236 : vector<1x32xf32>
    %238 = vector.extract_strided_slice %79 {offsets = [6, 0], sizes = [1, 128], strides = [1, 1]} : vector<8x128xf32> to vector<1x128xf32>
    %239 = arith.truncf %237 : vector<1x32xf32> to vector<1x32xbf16>
    %cst_109 = arith.constant dense<0.000000e+00> : vector<1x128xf32>
    %240 = tpu.matmul %239, %73, %cst_109 {dimension_numbers = #tpu.dot_dimension_numbers<[1], [0], [0], [1], [0, 0, 1, 1], [], []>} : vector<1x32xbf16>, vector<32x128xbf16>, vector<1x128xf32> -> vector<1x128xf32>
    %241 = arith.addf %238, %240 : vector<1x128xf32>
    %242 = math.tanh %241 : vector<1x128xf32>
    %243 = vector.extract_strided_slice %242 {offsets = [0, 0], sizes = [1, 32], strides = [1, 1]} : vector<1x128xf32> to vector<1x32xf32>
    %cst_110 = arith.constant 5.000000e-01 : f32
    %244 = vector.broadcast %cst_110 : f32 to vector<1x32xf32>
    %245 = arith.mulf %244, %243 : vector<1x32xf32>
    %cst_111 = arith.constant 5.000000e-01 : f32
    %246 = vector.broadcast %cst_111 : f32 to vector<1x32xf32>
    %247 = arith.addf %245, %246 : vector<1x32xf32>
    %248 = vector.extract_strided_slice %242 {offsets = [0, 32], sizes = [1, 32], strides = [1, 1]} : vector<1x128xf32> to vector<1x32xf32>
    %cst_112 = arith.constant 5.000000e-01 : f32
    %249 = vector.broadcast %cst_112 : f32 to vector<1x32xf32>
    %250 = arith.mulf %249, %248 : vector<1x32xf32>
    %cst_113 = arith.constant 5.000000e-01 : f32
    %251 = vector.broadcast %cst_113 : f32 to vector<1x32xf32>
    %252 = arith.addf %250, %251 : vector<1x32xf32>
    %253 = vector.extract_strided_slice %242 {offsets = [0, 64], sizes = [1, 32], strides = [1, 1]} : vector<1x128xf32> to vector<1x32xf32>
    %254 = vector.extract_strided_slice %242 {offsets = [0, 96], sizes = [1, 32], strides = [1, 1]} : vector<1x128xf32> to vector<1x32xf32>
    %cst_114 = arith.constant 5.000000e-01 : f32
    %255 = vector.broadcast %cst_114 : f32 to vector<1x32xf32>
    %256 = arith.mulf %255, %254 : vector<1x32xf32>
    %cst_115 = arith.constant 5.000000e-01 : f32
    %257 = vector.broadcast %cst_115 : f32 to vector<1x32xf32>
    %258 = arith.addf %256, %257 : vector<1x32xf32>
    %259 = arith.mulf %252, %235 : vector<1x32xf32>
    %260 = arith.mulf %247, %253 : vector<1x32xf32>
    %261 = arith.addf %259, %260 : vector<1x32xf32>
    %262 = math.tanh %261 : vector<1x32xf32>
    %263 = arith.mulf %258, %262 : vector<1x32xf32>
    %264 = vector.extract_strided_slice %79 {offsets = [7, 0], sizes = [1, 128], strides = [1, 1]} : vector<8x128xf32> to vector<1x128xf32>
    %265 = arith.truncf %263 : vector<1x32xf32> to vector<1x32xbf16>
    %cst_116 = arith.constant dense<0.000000e+00> : vector<1x128xf32>
    %266 = tpu.matmul %265, %73, %cst_116 {dimension_numbers = #tpu.dot_dimension_numbers<[1], [0], [0], [1], [0, 0, 1, 1], [], []>} : vector<1x32xbf16>, vector<32x128xbf16>, vector<1x128xf32> -> vector<1x128xf32>
    %267 = arith.addf %264, %266 : vector<1x128xf32>
    %268 = math.tanh %267 : vector<1x128xf32>
    %269 = vector.extract_strided_slice %268 {offsets = [0, 0], sizes = [1, 32], strides = [1, 1]} : vector<1x128xf32> to vector<1x32xf32>
    %cst_117 = arith.constant 5.000000e-01 : f32
    %270 = vector.broadcast %cst_117 : f32 to vector<1x32xf32>
    %271 = arith.mulf %270, %269 : vector<1x32xf32>
    %cst_118 = arith.constant 5.000000e-01 : f32
    %272 = vector.broadcast %cst_118 : f32 to vector<1x32xf32>
    %273 = arith.addf %271, %272 : vector<1x32xf32>
    %274 = vector.extract_strided_slice %268 {offsets = [0, 32], sizes = [1, 32], strides = [1, 1]} : vector<1x128xf32> to vector<1x32xf32>
    %cst_119 = arith.constant 5.000000e-01 : f32
    %275 = vector.broadcast %cst_119 : f32 to vector<1x32xf32>
    %276 = arith.mulf %275, %274 : vector<1x32xf32>
    %cst_120 = arith.constant 5.000000e-01 : f32
    %277 = vector.broadcast %cst_120 : f32 to vector<1x32xf32>
    %278 = arith.addf %276, %277 : vector<1x32xf32>
    %279 = vector.extract_strided_slice %268 {offsets = [0, 64], sizes = [1, 32], strides = [1, 1]} : vector<1x128xf32> to vector<1x32xf32>
    %280 = vector.extract_strided_slice %268 {offsets = [0, 96], sizes = [1, 32], strides = [1, 1]} : vector<1x128xf32> to vector<1x32xf32>
    %cst_121 = arith.constant 5.000000e-01 : f32
    %281 = vector.broadcast %cst_121 : f32 to vector<1x32xf32>
    %282 = arith.mulf %281, %280 : vector<1x32xf32>
    %cst_122 = arith.constant 5.000000e-01 : f32
    %283 = vector.broadcast %cst_122 : f32 to vector<1x32xf32>
    %284 = arith.addf %282, %283 : vector<1x32xf32>
    %285 = arith.mulf %278, %261 : vector<1x32xf32>
    %286 = arith.mulf %273, %279 : vector<1x32xf32>
    %287 = arith.addf %285, %286 : vector<1x32xf32>
    %288 = math.tanh %287 : vector<1x32xf32>
    %289 = arith.mulf %284, %288 : vector<1x32xf32>
    %c0_123 = arith.constant 0 : index
    %c0_124 = arith.constant 0 : index
    %290 = vector.load %arg4[%c0_123, %c0_124] : memref<34x128xf32, #tpu.memory_space<vmem>>, vector<32x128xf32>
    %cst_125 = arith.constant dense<0.000000e+00> : vector<1x128xf32>
    %291 = tpu.matmul %289, %290, %cst_125 {dimension_numbers = #tpu.dot_dimension_numbers<[1], [0], [0], [1], [0, 0, 1, 1], [], []>} : vector<1x32xf32>, vector<32x128xf32>, vector<1x128xf32> -> vector<1x128xf32>
    %c33 = arith.constant 33 : index
    %c0_126 = arith.constant 0 : index
    %292 = vector.load %arg4[%c33, %c0_126] : memref<34x128xf32, #tpu.memory_space<vmem>>, vector<1x128xf32>
    %293 = arith.addf %291, %292 : vector<1x128xf32>
    %294 = vector.extract_strided_slice %293 {offsets = [0, 0], sizes = [1, 2], strides = [1, 1]} : vector<1x128xf32> to vector<1x2xf32>
    %cst_127 = arith.constant dense<0xFF800000> : vector<1xf32>
    %295 = vector.multi_reduction <maximumf>, %294, %cst_127 [1] : vector<1x2xf32> to vector<1xf32>
    %296 = vector.shape_cast %295 : vector<1xf32> to vector<1x1xf32>
    %297 = vector.broadcast %296 : vector<1x1xf32> to vector<1x2xf32>
    %298 = arith.subf %294, %297 : vector<1x2xf32>
    %299 = math.exp %298 : vector<1x2xf32>
    %cst_128 = arith.constant dense<0.000000e+00> : vector<1xf32>
    %300 = vector.multi_reduction <add>, %299, %cst_128 [1] : vector<1x2xf32> to vector<1xf32>
    %301 = vector.shape_cast %300 : vector<1xf32> to vector<1x1xf32>
    %302 = vector.broadcast %301 : vector<1x1xf32> to vector<1x2xf32>
    %303 = arith.divf %299, %302 : vector<1x2xf32>
    %cst_129 = arith.constant 0.000000e+00 : f32
    %304 = vector.broadcast %cst_129 : f32 to vector<1x128xf32>
    %c0_130 = arith.constant 0 : index
    %c0_131 = arith.constant 0 : index
    %305 = vector.load %arg5[%c0_130, %c0_131] : memref<1x128xf32, #tpu.memory_space<vmem>>, vector<1x128xf32>
    tpu.vector_store %arg5[%c0_130, %c0_131], %304 {strides = array<i32>} : memref<1x128xf32, #tpu.memory_space<vmem>>, vector<1x128xf32>,
    %c0_132 = arith.constant 0 : index
    %c0_133 = arith.constant 0 : index
    %306 = vector.load %arg5[%c0_132, %c0_133] : memref<1x128xf32, #tpu.memory_space<vmem>>, vector<1x2xf32>
    tpu.vector_store %arg5[%c0_132, %c0_133], %303 {strides = array<i32>} : memref<1x128xf32, #tpu.memory_space<vmem>>, vector<1x2xf32>,
    %c0_134 = arith.constant 0 : index
    %c32_135 = arith.constant 32 : index
    %307 = vector.load %arg5[%c0_134, %c32_135] : memref<1x128xf32, #tpu.memory_space<vmem>>, vector<1x32xf32>
    tpu.vector_store %arg5[%c0_134, %c32_135], %289 {strides = array<i32>} : memref<1x128xf32, #tpu.memory_space<vmem>>, vector<1x32xf32>,
    %c0_136 = arith.constant 0 : index
    %c64 = arith.constant 64 : index
    %308 = vector.load %arg5[%c0_136, %c64] : memref<1x128xf32, #tpu.memory_space<vmem>>, vector<1x32xf32>
    tpu.vector_store %arg5[%c0_136, %c64], %287 {strides = array<i32>} : memref<1x128xf32, #tpu.memory_space<vmem>>, vector<1x32xf32>,
    return
  }
}

</mosaic_0001>

<bundles_post_ra>
// kernel: model_forward_pallas.1
= control target key start
LH: loop header
LB: loop body
LE: loop exit
PB: predicated region body
PF: predicated region fallthrough
CT: control target
= control target key end

     0   :  { %s1820_s0 = inlined_call_operand.vmem [shape: s32[8], index: 0, kind: input, shape index: {}]   ;;  %s1821_s1 = inlined_call_operand.vmem [shape: f32[20001,32], index: 1, kind: input, shape index: {}]   ;;  %s1822_s2 = inlined_call_operand.vmem [shape: f32[2,32], index: 2, kind: input, shape index: {}]   ;;  %s1823_s3 = inlined_call_operand.vmem [shape: bf16[64,128], index: 3, kind: input, shape index: {}]   ;;  %s1824_s4 = inlined_call_operand.vmem [shape: f32[34,128], index: 4, kind: input, shape index: {}]   ;;  %s1825_s5 = inlined_call_operand.vmem [shape: f32[1,128], index: 5, kind: output, shape index: {}]  }
   0x1   :  { %s10_s20 = sshll.u32 %s1820_s0, 4  ;;  %s11_s20 = int_to_ptr.vmem [resolvable:$true] %s10_s20 }
   0x2   :  { %s1562_s21 = scalar_lea.vmem %s11_s20, 16  ;;  %p1567_p1 = scmp.lt.s32.totalorder %s11_s20, %s11_s20 }
   0x3   :  { %p1563_p0 = scmp.ne.s32.totalorder %s11_s20, %s1562_s21  ;;  %p1568_p2 = scmp.lt.s32.totalorder %s1562_s21, %s1562_s21 }
   0x5   :  { %p1569_p3 = por %p1568_p2, %p1567_p1 }
   0x7   :  { %p1570_p4 = pnand %p1569_p3, %p1563_p0 }
   0x9   :  { %1573 = shalt.err (!%p1570_p4)  }
   0xa   :  { %s1592_s22 = smov [#allocation5]  }
   0xb   :  { %13 = dma.vmem_to_smem %s11_s20, 16, %s1592_s22, [#allocation4] }
   0xc   :  { %1574 = dma.done.wait [#allocation4], 16 }
   0xd   :  { %1575 = vsyncadd [#allocation4], 4294967280 }
   0xe   :  { %15 = sfence }
   0xf   :  { %s23_s23 = sld [smem:[#allocation5]] }
  0x15   :  { %s24_s26 = scalar_lea.vmem %s1821_s1, %s23_s23 }
  0x16   :  { %v42_v0 = vld [vmem:[%s24_s26] sm:$0x1] }
  0x17   :  { %43 = vst [vmem:[#allocation2] sm:$0x1] %v42_v0 }
  0x18   :  { %68 = vsyncadd [#allocation3], 16  ;;  %s1365_s0 = sld [smem:[#allocation5 + $0x1]] }
  0x1e   :  { %s70_s29 = scalar_lea.vmem %s1821_s1, %s1365_s0 }
  0x1f   :  { %v90_v1 = vld [vmem:[%s70_s29] sm:$0x1] }
  0x20   :  { %91 = vst [vmem:[#allocation2 + $0x1] sm:$0x1] %v90_v1 }
  0x21   :  { %116 = vsyncadd [#allocation3 + $0x1], 16  ;;  %s1366_s30 = sld [smem:[#allocation5 + $0x2]] }
  0x27   :  { %s118_s8 = scalar_lea.vmem %s1821_s1, %s1366_s30 }
  0x28   :  { %v138_v2 = vld [vmem:[%s118_s8] sm:$0x1] }
  0x29   :  { %139 = vst [vmem:[#allocation2 + $0x2] sm:$0x1] %v138_v2 }
  0x2a   :  { %164 = vsyncadd [#allocation3 + $0x2], 16  ;;  %s1367_s9 = sld [smem:[#allocation5 + $0x3]] }
  0x30   :  { %s166_s12 = scalar_lea.vmem %s1821_s1, %s1367_s9 }
  0x31   :  { %v186_v3 = vld [vmem:[%s166_s12] sm:$0x1] }
  0x32   :  { %187 = vst [vmem:[#allocation2 + $0x3] sm:$0x1] %v186_v3 }
  0x33   :  { %212 = vsyncadd [#allocation3 + $0x3], 16  ;;  %s1368_s13 = sld [smem:[#allocation5 + $0x4]] }
  0x39   :  { %s214_s16 = scalar_lea.vmem %s1821_s1, %s1368_s13 }
  0x3a   :  { %v234_v4 = vld [vmem:[%s214_s16] sm:$0x1] }
  0x3b   :  { %235 = vst [vmem:[#allocation2 + $0x4] sm:$0x1] %v234_v4 }
  0x3c   :  { %260 = vsyncadd [#allocation3 + $0x4], 16  ;;  %s1369_s17 = sld [smem:[#allocation5 + $0x5]] }
  0x42   :  { %s262_s20 = scalar_lea.vmem %s1821_s1, %s1369_s17 }
  0x43   :  { %v282_v5 = vld [vmem:[%s262_s20] sm:$0x1] }
  0x44   :  { %283 = vst [vmem:[#allocation2 + $0x5] sm:$0x1] %v282_v5 }
  0x45   :  { %308 = vsyncadd [#allocation3 + $0x5], 16  ;;  %s1370_s21 = sld [smem:[#allocation5 + $0x6]] }
  0x4b   :  { %s310_s24 = scalar_lea.vmem %s1821_s1, %s1370_s21 }
  0x4c   :  { %v330_v6 = vld [vmem:[%s310_s24] sm:$0x1] }
  0x4d   :  { %331 = vst [vmem:[#allocation2 + $0x6] sm:$0x1] %v330_v6 }
  0x4e   :  { %356 = vsyncadd [#allocation3 + $0x6], 16  ;;  %s1371_s25 = sld [smem:[#allocation5 + $0x7]] }
  0x54   :  { %s358_s27 = scalar_lea.vmem %s1821_s1, %s1371_s25 }
  0x55   :  { %v378_v7 = vld [vmem:[%s358_s27] sm:$0x1] }
  0x56   :  { %379 = vst [vmem:[#allocation2 + $0x7] sm:$0x1] %v378_v7 }
  0x57   :  { %404 = vsyncadd [#allocation3 + $0x7], 16 }
  0x58   :  { %1576 = dma.done.wait [#allocation3], 16 }
  0x59   :  { %1577 = vsyncadd [#allocation3], 4294967280 }
  0x5a   :  { %1578 = dma.done.wait [#allocation3 + $0x1], 16 }
  0x5b   :  { %1579 = vsyncadd [#allocation3 + $0x1], 4294967280 }
  0x5c   :  { %1580 = dma.done.wait [#allocation3 + $0x2], 16 }
  0x5d   :  { %1581 = vsyncadd [#allocation3 + $0x2], 4294967280 }
  0x5e   :  { %1582 = dma.done.wait [#allocation3 + $0x3], 16 }
  0x5f   :  { %1583 = vsyncadd [#allocation3 + $0x3], 4294967280 }
  0x60   :  { %1584 = dma.done.wait [#allocation3 + $0x4], 16 }
  0x61   :  { %1585 = vsyncadd [#allocation3 + $0x4], 4294967280 }
  0x62   :  { %1586 = dma.done.wait [#allocation3 + $0x5], 16 }
  0x63   :  { %1587 = vsyncadd [#allocation3 + $0x5], 4294967280 }
  0x64   :  { %1588 = dma.done.wait [#allocation3 + $0x6], 16 }
  0x65   :  { %1589 = vsyncadd [#allocation3 + $0x6], 4294967280 }
  0x66   :  { %1590 = dma.done.wait [#allocation3 + $0x7], 16 }
  0x67   :  { %1591 = vsyncadd [#allocation3 + $0x7], 4294967280  ;;  %v1593_v8 = vmov 0.0   ;;  %vm1594_vm0 = vmmov 0   ;;  %v1522_v9 = vld [vmem:[%s1823_s3] sm:$0xff]   ;;  %v1671_v10 = vld [vmem:[%s1823_s3 + $0x10] sm:$0xff]  }
  0x68   :  { %1427 = vmatprep.subr.bf16.mxu0 %v1593_v8  ;;  %1198 = vst [vmem:[%s1825_s5] sm:$0x1] %v1593_v8  ;;  %1435 = vmatprep.subr.bf16.mxu1 %v1593_v8  ;;  %v1524_v11 = vld [vmem:[%s1823_s3 + $0x8] sm:$0xff]   ;;  %v1681_v12 = vld [vmem:[%s1823_s3 + $0x18] sm:$0xff]   ;;  %v431_v13 = vld [vmem:[#allocation2] sm:$0xff]  ;;  %vm449_vm1 = vcmask 261120   ;;  %s1595_s15 = smov 64  }
  0x69   :  { %1431 = vmatprep.mubr.msk.bf16.mxu0 %vm1594_vm0, %v1593_v8  ;;  %1439 = vmatprep.mubr.msk.bf16.mxu1 %vm1594_vm0, %v1593_v8  ;;  %v493_v14 = vld [vmem:[%s1822_s2] sm:$0x1]  ;;  %v432_v15 = vpack.c.bf16 %v431_v13, %v431_v13  ;;  %v494_v29 = vld [vmem:[%s1822_s2 + $0x1] sm:$0x1]  ;;  %s1596_s18 = smov 32   ;;  %vm1186_vm2 = vcmask 8192  }
  0x6a   :  { %1428 = vmatpush3.bf16.msra.mxu0 %v1522_v9  ;;  %1436 = vmatpush3.bf16.msra.mxu1 %v1671_v10  ;;  %v495_v16 = vpack.c.bf16 %v493_v14, %v493_v14  ;;  %v1372_v17 = vld [vmem:[%s1824_s4 + $0x20] ss:$0 sm:$0xff]  ;;  %vm1203_vm3 = vcmask 523527   ;;  %vm1209_vm4 = vcmask 785927  }
  0x6b   :  { %1429 = vmatprep.subr.bf16.mxu0 %v1593_v8  ;;  %1437 = vmatprep.subr.bf16.mxu1 %v1593_v8 }
  0x6e   :  { %1430 = vmatpush3.bf16.msra.mxu0 %v1524_v11  ;;  %1438 = vmatpush3.bf16.msra.mxu1 %v1681_v12 }
  0x6f   :  { %1443 = vmatprep.subr.bf16.mxu0 %v1593_v8  ;;  %1451 = vmatprep.subr.bf16.mxu1 %v1593_v8 }
  0x71   :  { %1432 = vmatmul.mubr.msk.bf16.vlgmr.msra.gmra.mrb[0].mxu0 %vm449_vm1, %v432_v15  ;;  %1440 = vmatmul.mubr.msk.bf16.vlgmr.msra.gmra.mrb[0].mxu1 %vm449_vm1, %v495_v16 }
  0x72   :  { %1444 = vmatpush3.bf16.msra.mxu0 %v1671_v10  ;;  %1447 = vmatprep.mubr.msk.bf16.mxu0 %vm1594_vm0, %v1593_v8 }
  0x73   :  { %1445 = vmatprep.subr.bf16.mxu0 %v1593_v8  ;;  %1452 = vmatpush3.bf16.msra.mxu1 %v1671_v10 }
  0x74   :  { %1455 = vmatprep.mubr.msk.bf16.mxu1 %vm1594_vm0, %v1593_v8  ;;  %1453 = vmatprep.subr.bf16.mxu1 %v1593_v8 }
  0x76   :  { %1446 = vmatpush3.bf16.msra.mxu0 %v1681_v12 }
  0x77   :  { %1459 = vmatprep.subr.bf16.mxu0 %v1593_v8  ;;  %1454 = vmatpush3.bf16.msra.mxu1 %v1681_v12 }
  0x78   :  { %1467 = vmatprep.subr.bf16.mxu1 %v1593_v8 }
 0x144   :  { %v487_v18 = vpop.f32.mrb[0].mxu0  ;;  %v545_v20 = vpop.f32.mrb[0].mxu1 }
 0x145   :  { %v1707_v19 = vadd.f32 %v1372_v17, %v487_v18  ;;  %v1433_v21 = vpop.f32.mrb[1].mxu0  ;;  %v1441_v22 = vpop.f32.mrb[1].mxu1 }
 0x146   :  { %v490_v23 = vpop.f32.mrb[2].mxu0  ;;  %v548_v25 = vpop.f32.mrb[2].mxu1 }
 0x147   :  { %v551_v24 = vadd.f32 %v545_v20, %v1707_v19  ;;  %v1434_v26 = vpop.f32.mrb[3].mxu0  ;;  %v1442_v27 = vpop.f32.mrb[3].mxu1 }
 0x149   :  { %1526 = vtanh.f32 %v551_v24 }
 0x153   :  { %v1527_v28 = vpop.eup %1526 }
 0x154   :  { %561 = vrot.lane.b32.xlu0 %v1527_v28, %s1595_s15  ;;  %v553_v30 = vmul.f32 0.5, %v1527_v28 }
 0x156   :  { %v554_v31 = vadd.f32 0.5, %v553_v30 }
 0x158   :  { %556 = vrot.lane.b32.xlu0 %v494_v29, %s1596_s18 }
 0x1c6   :  { %v562_v32 = vpop.permute.xlu0 %561 }
 0x1c7   :  { %v564_v33 = vmul.f32 %v562_v32, %v554_v31 }
 0x1c9   :  { %566 = vrot.lane.b32.xlu1 %v564_v33, %s1596_s18 }
 0x1ca   :  { %v557_v34 = vpop.permute.xlu0 %556 }
 0x1cb   :  { %v559_v35 = vmul.f32 %v557_v34, %v554_v31 }
 0x23b   :  { %v567_v36 = vpop.permute.xlu1 %566 }
 0x23c   :  { %v569_v37 = vadd.f32 %v567_v36, %v559_v35 }
 0x23e   :  { %1528 = vtanh.f32 %v569_v37  ;;  %v631_v54 = vrot.slane %v569_v37, 7 }
 0x248   :  { %v1529_v38 = vpop.eup %1528 }
 0x249   :  { %572 = vrot.lane.b32.xlu1 %v1529_v38, %s1595_s15 }
 0x2bb   :  { %v573_v39 = vpop.permute.xlu1 %572 }
 0x2bc   :  { %v575_v40 = vmul.f32 %v573_v39, %v554_v31 }
 0x2be   :  { %v576_v41 = vpack.c.bf16 %v575_v40, %v575_v40 }
 0x2c0   :  { %578 = vrot.lane.b32.xlu0 %v576_v41, %s1596_s18 }
 0x332   :  { %v579_v42 = vpop.permute.xlu0 %578 }
 0x333   :  { %1448 = vmatmul.mubr.msk.bf16.vlgmr.msra.gmra.mrb[4].mxu0 %vm449_vm1, %v579_v42 }
 0x334   :  { %1460 = vmatpush3.bf16.msra.mxu0 %v1671_v10  ;;  %1463 = vmatprep.mubr.msk.bf16.mxu0 %vm1594_vm0, %v1593_v8 }
 0x335   :  { %1461 = vmatprep.subr.bf16.mxu0 %v1593_v8 }
 0x338   :  { %1462 = vmatpush3.bf16.msra.mxu0 %v1681_v12 }
 0x339   :  { %1475 = vmatprep.subr.bf16.mxu0 %v1593_v8 }
 0x406   :  { %v617_v43 = vpop.f32.mrb[4].mxu0 }
 0x407   :  { %v624_v44 = vrot.slane %v617_v43, 7  ;;  %v1449_v45 = vpop.f32.mrb[5].mxu0 }
 0x408   :  { %v620_v46 = vpop.f32.mrb[6].mxu0 }
 0x409   :  { %v626_v47 = vadd.f32 %v624_v44, %v1707_v19  ;;  %v1450_v48 = vpop.f32.mrb[7].mxu0 }
 0x40b   :  { %1530 = vtanh.f32 %v626_v47 }
 0x415   :  { %v1531_v49 = vpop.eup %1530 }
 0x416   :  { %635 = vrot.lane.b32.xlu1 %v1531_v49, %s1595_s15  ;;  %v628_v50 = vmul.f32 0.5, %v1531_v49 }
 0x418   :  { %v629_v51 = vadd.f32 0.5, %v628_v50 }
 0x41a   :  { %v633_v55 = vmul.f32 %v631_v54, %v629_v51 }
 0x488   :  { %v636_v52 = vpop.permute.xlu1 %635 }
 0x489   :  { %v638_v53 = vmul.f32 %v636_v52, %v629_v51 }
 0x48b   :  { %640 = vrot.lane.b32.xlu0 %v638_v53, %s1596_s18 }
 0x4fd   :  { %v641_v56 = vpop.permute.xlu0 %640 }
 0x4fe   :  { %v643_v57 = vadd.f32 %v641_v56, %v633_v55 }
 0x500   :  { %1532 = vtanh.f32 %v643_v57  ;;  %v707_v14 = vrot.slane %v643_v57, 7 }
 0x50a   :  { %v1533_v58 = vpop.eup %1532 }
 0x50b   :  { %646 = vrot.lane.b32.xlu1 %v1533_v58, %s1595_s15 }
 0x57d   :  { %v647_v59 = vpop.permute.xlu1 %646 }
 0x57e   :  { %v649_v60 = vmul.f32 %v647_v59, %v629_v51 }
 0x580   :  { %v650_v61 = vpack.c.bf16 %v649_v60, %v649_v60 }
 0x582   :  { %v652_v62 = vshrl.u32 %v650_v61, 16 }
 0x584   :  { %654 = vrot.lane.b32.xlu0 %v652_v62, %s1596_s18 }
 0x5f6   :  { %v655_v63 = vpop.permute.xlu0 %654 }
 0x5f7   :  { %1456 = vmatmul.mubr.msk.bf16.vlgmr.msra.gmra.mrb[4].mxu1 %vm449_vm1, %v655_v63 }
 0x5f8   :  { %1468 = vmatpush3.bf16.msra.mxu1 %v1671_v10  ;;  %1471 = vmatprep.mubr.msk.bf16.mxu1 %vm1594_vm0, %v1593_v8 }
 0x5f9   :  { %1469 = vmatprep.subr.bf16.mxu1 %v1593_v8 }
 0x5fc   :  { %1470 = vmatpush3.bf16.msra.mxu1 %v1681_v12 }
 0x5fd   :  { %1483 = vmatprep.subr.bf16.mxu1 %v1593_v8 }
 0x6ca   :  { %v693_v0 = vpop.f32.mrb[4].mxu1 }
 0x6cb   :  { %v700_v1 = vrot.slane %v693_v0, 6  ;;  %v1457_v2 = vpop.f32.mrb[5].mxu1 }
 0x6cc   :  { %v696_v3 = vpop.f32.mrb[6].mxu1 }
 0x6cd   :  { %v702_v4 = vadd.f32 %v700_v1, %v1707_v19  ;;  %v1458_v5 = vpop.f32.mrb[7].mxu1 }
 0x6cf   :  { %1534 = vtanh.f32 %v702_v4 }
 0x6d9   :  { %v1535_v6 = vpop.eup %1534 }
 0x6da   :  { %711 = vrot.lane.b32.xlu1 %v1535_v6, %s1595_s15  ;;  %v704_v7 = vmul.f32 0.5, %v1535_v6 }
 0x6dc   :  { %v705_v9 = vadd.f32 0.5, %v704_v7 }
 0x6de   :  { %v709_v15 = vmul.f32 %v707_v14, %v705_v9 }
 0x74c   :  { %v712_v11 = vpop.permute.xlu1 %711 }
 0x74d   :  { %v714_v13 = vmul.f32 %v712_v11, %v705_v9 }
 0x74f   :  { %716 = vrot.lane.b32.xlu0 %v714_v13, %s1596_s18 }
 0x7c1   :  { %v717_v16 = vpop.permute.xlu0 %716 }
 0x7c2   :  { %v719_v17 = vadd.f32 %v717_v16, %v709_v15 }
 0x7c4   :  { %1536 = vtanh.f32 %v719_v17  ;;  %v782_v36 = vrot.slane %v719_v17, 7 }
 0x7ce   :  { %v1537_v18 = vpop.eup %1536 }
 0x7cf   :  { %722 = vrot.lane.b32.xlu1 %v1537_v18, %s1595_s15 }
 0x841   :  { %v723_v20 = vpop.permute.xlu1 %722 }
 0x842   :  { %v725_v21 = vmul.f32 %v723_v20, %v705_v9 }
 0x844   :  { %v726_v22 = vpack.c.bf16 %v725_v21, %v725_v21 }
 0x846   :  { %v728_v23 = vrot.slane %v726_v22, 1 }
 0x848   :  { %729 = vrot.lane.b32.xlu0 %v728_v23, %s1596_s18 }
 0x8ba   :  { %v730_v24 = vpop.permute.xlu0 %729 }
 0x8bb   :  { %1464 = vmatmul.mubr.msk.bf16.vlgmr.msra.gmra.mrb[8].mxu0 %vm449_vm1, %v730_v24 }
 0x8bc   :  { %1476 = vmatpush3.bf16.msra.mxu0 %v1671_v10  ;;  %1479 = vmatprep.mubr.msk.bf16.mxu0 %vm1594_vm0, %v1593_v8 }
 0x8bd   :  { %1477 = vmatprep.subr.bf16.mxu0 %v1593_v8 }
 0x8c0   :  { %1478 = vmatpush3.bf16.msra.mxu0 %v1681_v12 }
 0x8c1   :  { %1491 = vmatprep.subr.bf16.mxu0 %v1593_v8 }
 0x98e   :  { %v768_v25 = vpop.f32.mrb[8].mxu0 }
 0x98f   :  { %v775_v26 = vrot.slane %v768_v25, 5  ;;  %v1465_v27 = vpop.f32.mrb[9].mxu0 }
 0x990   :  { %v771_v28 = vpop.f32.mrb[10].mxu0 }
 0x991   :  { %v777_v29 = vadd.f32 %v775_v26, %v1707_v19  ;;  %v1466_v30 = vpop.f32.mrb[11].mxu0 }
 0x993   :  { %1538 = vtanh.f32 %v777_v29 }
 0x99d   :  { %v1539_v31 = vpop.eup %1538 }
 0x99e   :  { %786 = vrot.lane.b32.xlu1 %v1539_v31, %s1595_s15  ;;  %v779_v32 = vmul.f32 0.5, %v1539_v31 }
 0x9a0   :  { %v780_v33 = vadd.f32 0.5, %v779_v32 }
 0x9a2   :  { %v784_v37 = vmul.f32 %v782_v36, %v780_v33 }
 0xa10   :  { %v787_v34 = vpop.permute.xlu1 %786 }
 0xa11   :  { %v789_v35 = vmul.f32 %v787_v34, %v780_v33 }
 0xa13   :  { %791 = vrot.lane.b32.xlu0 %v789_v35, %s1596_s18 }
 0xa85   :  { %v792_v38 = vpop.permute.xlu0 %791 }
 0xa86   :  { %v794_v39 = vadd.f32 %v792_v38, %v784_v37 }
 0xa88   :  { %1540 = vtanh.f32 %v794_v39  ;;  %v859_v58 = vrot.slane %v794_v39, 7 }
 0xa92   :  { %v1541_v40 = vpop.eup %1540 }
 0xa93   :  { %797 = vrot.lane.b32.xlu1 %v1541_v40, %s1595_s15 }
 0xb05   :  { %v798_v41 = vpop.permute.xlu1 %797 }
 0xb06   :  { %v800_v42 = vmul.f32 %v798_v41, %v780_v33 }
 0xb08   :  { %v801_v43 = vpack.c.bf16 %v800_v42, %v800_v42 }
 0xb0a   :  { %v803_v44 = vshrl.u32 %v801_v43, 16 }
 0xb0c   :  { %v805_v45 = vrot.slane %v803_v44, 1 }
 0xb0e   :  { %806 = vrot.lane.b32.xlu0 %v805_v45, %s1596_s18 }
 0xb80   :  { %v807_v46 = vpop.permute.xlu0 %806 }
 0xb81   :  { %1472 = vmatmul.mubr.msk.bf16.vlgmr.msra.gmra.mrb[8].mxu1 %vm449_vm1, %v807_v46 }
 0xb82   :  { %1484 = vmatpush3.bf16.msra.mxu1 %v1671_v10  ;;  %1487 = vmatprep.mubr.msk.bf16.mxu1 %vm1594_vm0, %v1593_v8 }
 0xb83   :  { %1485 = vmatprep.subr.bf16.mxu1 %v1593_v8 }
 0xb86   :  { %1486 = vmatpush3.bf16.msra.mxu1 %v1681_v12 }
 0xc54   :  { %v845_v47 = vpop.f32.mrb[8].mxu1 }
 0xc55   :  { %v852_v48 = vrot.slane %v845_v47, 4  ;;  %v1473_v49 = vpop.f32.mrb[9].mxu1 }
 0xc56   :  { %v848_v50 = vpop.f32.mrb[10].mxu1 }
 0xc57   :  { %v854_v51 = vadd.f32 %v852_v48, %v1707_v19  ;;  %v1474_v52 = vpop.f32.mrb[11].mxu1 }
 0xc59   :  { %1542 = vtanh.f32 %v854_v51 }
 0xc63   :  { %v1543_v53 = vpop.eup %1542 }
 0xc64   :  { %863 = vrot.lane.b32.xlu1 %v1543_v53, %s1595_s15  ;;  %v856_v54 = vmul.f32 0.5, %v1543_v53 }
 0xc66   :  { %v857_v55 = vadd.f32 0.5, %v856_v54 }
 0xc68   :  { %v861_v59 = vmul.f32 %v859_v58, %v857_v55 }
 0xcd6   :  { %v864_v56 = vpop.permute.xlu1 %863 }
 0xcd7   :  { %v866_v57 = vmul.f32 %v864_v56, %v857_v55 }
 0xcd9   :  { %868 = vrot.lane.b32.xlu0 %v866_v57, %s1596_s18 }
 0xd4b   :  { %v869_v60 = vpop.permute.xlu0 %868 }
 0xd4c   :  { %v871_v61 = vadd.f32 %v869_v60, %v861_v59 }
 0xd4e   :  { %1544 = vtanh.f32 %v871_v61  ;;  %v934_v17 = vrot.slane %v871_v61, 7 }
 0xd58   :  { %v1545_v62 = vpop.eup %1544 }
 0xd59   :  { %874 = vrot.lane.b32.xlu1 %v1545_v62, %s1595_s15 }
 0xdcb   :  { %v875_v63 = vpop.permute.xlu1 %874 }
 0xdcc   :  { %v877_v0 = vmul.f32 %v875_v63, %v857_v55  ;;  %v1106_v63 = vld [vmem:[%s1824_s4 + $0x8] sm:$0xff] }
 0xdce   :  { %v878_v1 = vpack.c.bf16 %v877_v0, %v877_v0  ;;  %v1107_v0 = vld [vmem:[%s1824_s4 + $0x10] sm:$0xff] }
 0xdd0   :  { %v880_v2 = vrot.slane %v878_v1, 2  ;;  %v1597_v1 = vmov 0.0|0.0  }
 0xdd1   :  { %1510 = vmatprep.subr.bf16.mxu1 %v1597_v1 }
 0xdd2   :  { %881 = vrot.lane.b32.xlu0 %v880_v2, %s1596_s18 }
 0xe44   :  { %v882_v3 = vpop.permute.xlu0 %881 }
 0xe45   :  { %1480 = vmatmul.mubr.msk.bf16.vlgmr.msra.gmra.mrb[12].mxu0 %vm449_vm1, %v882_v3  ;;  %v1108_v3 = vld [vmem:[%s1824_s4 + $0x18] sm:$0xff] }
 0xe46   :  { %1492 = vmatpush3.bf16.msra.mxu0 %v1671_v10  ;;  %1495 = vmatprep.mubr.msk.bf16.mxu0 %vm1594_vm0, %v1593_v8 }
 0xe47   :  { %1493 = vmatprep.subr.bf16.mxu0 %v1593_v8 }
 0xe4a   :  { %1494 = vmatpush3.bf16.msra.mxu0 %v1681_v12 }
 0xf18   :  { %v920_v4 = vpop.f32.mrb[12].mxu0 }
 0xf19   :  { %v927_v5 = vrot.slane %v920_v4, 3  ;;  %v1481_v6 = vpop.f32.mrb[13].mxu0  ;;  %v1514_v4 = vpack.c.bf16 %v1108_v3, %v1107_v0 }
 0xf1a   :  { %v923_v7 = vpop.f32.mrb[14].mxu0 }
 0xf1b   :  { %v929_v9 = vadd.f32 %v927_v5, %v1707_v19  ;;  %v1482_v11 = vpop.f32.mrb[15].mxu0 }
 0xf1d   :  { %1546 = vtanh.f32 %v929_v9 }
 0xf27   :  { %v1547_v13 = vpop.eup %1546 }
 0xf28   :  { %938 = vrot.lane.b32.xlu1 %v1547_v13, %s1595_s15  ;;  %v931_v14 = vmul.f32 0.5, %v1547_v13  ;;  %v1109_v13 = vld [vmem:[%s1824_s4 + $0x21] sm:$0x1] }
 0xf2a   :  { %v932_v10 = vadd.f32 0.5, %v931_v14 }
 0xf2c   :  { %v936_v18 = vmul.f32 %v934_v17, %v932_v10 }
 0xf9a   :  { %v939_v15 = vpop.permute.xlu1 %938 }
 0xf9b   :  { %v941_v16 = vmul.f32 %v939_v15, %v932_v10 }
 0xf9d   :  { %943 = vrot.lane.b32.xlu0 %v941_v16, %s1596_s18 }
0x100f   :  { %v944_v12 = vpop.permute.xlu0 %943 }
0x1010   :  { %v946_v20 = vadd.f32 %v944_v12, %v936_v18 }
0x1012   :  { %1548 = vtanh.f32 %v946_v20  ;;  %v1011_v39 = vrot.slane %v946_v20, 7 }
0x101c   :  { %v1549_v21 = vpop.eup %1548 }
0x101d   :  { %949 = vrot.lane.b32.xlu1 %v1549_v21, %s1595_s15 }
0x108f   :  { %v950_v22 = vpop.permute.xlu1 %949 }
0x1090   :  { %v952_v23 = vmul.f32 %v950_v22, %v932_v10 }
0x1092   :  { %v953_v24 = vpack.c.bf16 %v952_v23, %v952_v23 }
0x1094   :  { %v955_v25 = vshrl.u32 %v953_v24, 16 }
0x1096   :  { %v957_v26 = vrot.slane %v955_v25, 2 }
0x1098   :  { %958 = vrot.lane.b32.xlu0 %v957_v26, %s1596_s18 }
0x110a   :  { %v959_v27 = vpop.permute.xlu0 %958 }
0x110b   :  { %1488 = vmatmul.mubr.msk.bf16.vlgmr.msra.gmra.mrb[12].mxu1 %vm449_vm1, %v959_v27 }
0x110c   :  { %1507 = vmatprep.mubr.msk.f32.mxu1 %vm1594_vm0, %v1593_v8 }
0x11de   :  { %v997_v28 = vpop.f32.mrb[12].mxu1 }
0x11df   :  { %v1004_v29 = vrot.slane %v997_v28, 2  ;;  %v1489_v30 = vpop.f32.mrb[13].mxu1 }
0x11e0   :  { %v1000_v31 = vpop.f32.mrb[14].mxu1 }
0x11e1   :  { %v1006_v32 = vadd.f32 %v1004_v29, %v1707_v19  ;;  %v1490_v33 = vpop.f32.mrb[15].mxu1 }
0x11e3   :  { %1550 = vtanh.f32 %v1006_v32 }
0x11ed   :  { %v1551_v34 = vpop.eup %1550 }
0x11ee   :  { %1015 = vrot.lane.b32.xlu1 %v1551_v34, %s1595_s15  ;;  %v1008_v35 = vmul.f32 0.5, %v1551_v34 }
0x11f0   :  { %v1009_v36 = vadd.f32 0.5, %v1008_v35 }
0x11f2   :  { %v1013_v40 = vmul.f32 %v1011_v39, %v1009_v36 }
0x1260   :  { %v1016_v37 = vpop.permute.xlu1 %1015 }
0x1261   :  { %v1018_v38 = vmul.f32 %v1016_v37, %v1009_v36 }
0x1263   :  { %1020 = vrot.lane.b32.xlu0 %v1018_v38, %s1596_s18 }
0x12d5   :  { %v1021_v8 = vpop.permute.xlu0 %1020 }
0x12d6   :  { %v1023_v41 = vadd.f32 %v1021_v8, %v1013_v40 }
0x12d8   :  { %1552 = vtanh.f32 %v1023_v41  ;;  %v1086_v59 = vrot.slane %v1023_v41, 7 }
0x12e2   :  { %v1553_v42 = vpop.eup %1552 }
0x12e3   :  { %1026 = vrot.lane.b32.xlu1 %v1553_v42, %s1595_s15 }
0x1355   :  { %v1027_v43 = vpop.permute.xlu1 %1026 }
0x1356   :  { %v1029_v44 = vmul.f32 %v1027_v43, %v1009_v36 }
0x1358   :  { %v1030_v45 = vpack.c.bf16 %v1029_v44, %v1029_v44 }
0x135a   :  { %v1032_v46 = vrot.slane %v1030_v45, 3 }
0x135c   :  { %1033 = vrot.lane.b32.xlu0 %v1032_v46, %s1596_s18 }
0x13ce   :  { %v1034_v47 = vpop.permute.xlu0 %1033 }
0x13cf   :  { %1496 = vmatmul.mubr.msk.bf16.vlgmr.msra.gmra.mrb[16].mxu0 %vm449_vm1, %v1034_v47 }
0x14a2   :  { %v1072_v48 = vpop.f32.mrb[16].mxu0 }
0x14a3   :  { %v1079_v49 = vrot.slane %v1072_v48, 1  ;;  %v1497_v50 = vpop.f32.mrb[17].mxu0 }
0x14a4   :  { %v1075_v51 = vpop.f32.mrb[18].mxu0 }
0x14a5   :  { %v1081_v52 = vadd.f32 %v1079_v49, %v1707_v19  ;;  %v1498_v53 = vpop.f32.mrb[19].mxu0  ;;  %v1105_v19 = vld [vmem:[%s1824_s4] sm:$0xff] }
0x14a6   :  { %v1511_v2 = vpack.c.bf16 %v1106_v63, %v1105_v19 }
0x14a7   :  { %1554 = vtanh.f32 %v1081_v52 }
0x14a8   :  { %1512 = vmatpush3.bf16.msra.mxu1 %v1511_v2 }
0x14a9   :  { %1513 = vmatprep.subr.bf16.mxu1 %v1597_v1 }
0x14ac   :  { %1515 = vmatpush3.bf16.msra.mxu1 %v1514_v4 }
0x14b1   :  { %v1555_v54 = vpop.eup %1554 }
0x14b2   :  { %1090 = vrot.lane.b32.xlu1 %v1555_v54, %s1595_s15  ;;  %v1083_v55 = vmul.f32 0.5, %v1555_v54 }
0x14b4   :  { %v1084_v56 = vadd.f32 0.5, %v1083_v55 }
0x14b6   :  { %v1088_v60 = vmul.f32 %v1086_v59, %v1084_v56 }
0x1524   :  { %v1091_v57 = vpop.permute.xlu1 %1090 }
0x1525   :  { %v1093_v58 = vmul.f32 %v1091_v57, %v1084_v56 }
0x1527   :  { %1095 = vrot.lane.b32.xlu0 %v1093_v58, %s1596_s18 }
0x1599   :  { %v1096_v61 = vpop.permute.xlu0 %1095 }
0x159a   :  { %v1098_v62 = vadd.f32 %v1096_v61, %v1088_v60 }
0x159c   :  { %1556 = vtanh.f32 %v1098_v62 }
0x15a6   :  { %v1557_v5 = vpop.eup %1556 }
0x15a7   :  { %1101 = vrot.lane.b32.xlu1 %v1557_v5, %s1595_s15 }
0x1619   :  { %v1102_v6 = vpop.permute.xlu1 %1101 }
0x161a   :  { %v1104_v7 = vmul.f32 %v1102_v6, %v1084_v56 }
0x161c   :  { %v1111_v9 = vrot.slane %v1104_v7, 7 }
0x161e   :  { %1112 = vrot.lane.b32.xlu0 %v1111_v9, %s1596_s18 }
0x1690   :  { %v1113_v11 = vpop.permute.xlu0 %1112 }
0x1691   :  { %1508 = vmatmul.mubr.msk.f32.vlgmr.msra.gmra.mrb[16].mxu1 %vm449_vm1, %v1113_v11 }
0x1764   :  { %v1182_v14 = vpop.f32.mrb[16].mxu1 }
0x1765   :  { %v1183_v10 = vadd.f32 %v1182_v14, %v1109_v13  ;;  %v1509_v15 = vpop.f32.mrb[17].mxu1 }
0x1767   :  { %v1187_v16 = vsel %vm1186_vm2, %v1183_v10, -inf }
0x1768   :  { %1188 = vmax.xlane.f32.xlu1 %v1187_v16 }
0x1779   :  { %1206 = vrot.lane.b32.xlu1 %v1098_v62, %s1596_s18 }
0x17f5   :  { %v1189_v17 = vpop.xlane.xlu1 %1188 }
0x17f6   :  { %v1190_v18 = vsub.f32 %v1183_v10, %v1189_v17 }
0x17f8   :  { %v1191_v12 = vmul.f32 1.442695, %v1190_v18 }
0x17f9   :  { %v1207_v26 = vpop.permute.xlu1 %1206 }
0x17fa   :  { %1558 = vpow2.f32 %v1191_v12 }
0x1804   :  { %v1559_v20 = vpop.eup %1558 }
0x1805   :  { %v1193_v21 = vsel %vm1186_vm2, %v1559_v20, 0.0 }
0x1806   :  { %1194 = vadd.xlane.f32.xlu0 %v1193_v21 }
0x181c   :  { %1200 = vrot.lane.b32.xlu0 %v1104_v7, %s1595_s15 }
0x1893   :  { %v1195_v22 = vpop.xlane.xlu0 %1194 }
0x1894   :  { %1560 = vrcp.f32 %v1195_v22 }
0x1897   :  { %v1201_v25 = vpop.permute.xlu0 %1200 }
0x189e   :  { %v1561_v23 = vpop.eup %1560 }
0x189f   :  { %v1197_v24 = vmul.f32 %v1561_v23, %v1559_v20 }
0x18a1   :  { %1199 = vst.msk [vmem:[%s1825_s5] sm:$0x1] %vm1186_vm2, %v1197_v24 }
0x18a2   :  { %1204 = vst.msk [vmem:[%s1825_s5 - $0x7] sm:$0x80] %vm1203_vm3, %v1201_v25 }
0x18a3   :  { %1210 = vst.msk [vmem:[%s1825_s5 - $0x7] sm:$0x80] %vm1209_vm4, %v1207_v26 }
0x18a4   :  { %1215 = vsyncmov [#allocation3] }
0x18a7   :  { %s1216_s6 = vpop.sfrf %1215 }
0x18a8   :  { %p1387_p5 = scmp.ne.s32.totalorder %s1216_s6, 0 }
0x18aa   :  { %1220 = shalt.err (%p1387_p5)  }
0x18ab   :  { %1222 = vsyncmov [#allocation3 + $0x1] }
0x18ae   :  { %s1223_s7 = vpop.sfrf %1222 }
0x18af   :  { %p1388_p6 = scmp.ne.s32.totalorder %s1223_s7, 0 }
0x18b1   :  { %1227 = shalt.err (%p1388_p6)  }
0x18b2   :  { %1229 = vsyncmov [#allocation3 + $0x2] }
0x18b5   :  { %s1230_s8 = vpop.sfrf %1229 }
0x18b6   :  { %p1389_p7 = scmp.ne.s32.totalorder %s1230_s8, 0 }
0x18b8   :  { %1234 = shalt.err (%p1389_p7)  }
0x18b9   :  { %1236 = vsyncmov [#allocation3 + $0x3] }
0x18bc   :  { %s1237_s9 = vpop.sfrf %1236 }
0x18bd   :  { %p1390_p8 = scmp.ne.s32.totalorder %s1237_s9, 0 }
0x18bf   :  { %1241 = shalt.err (%p1390_p8)  }
0x18c0   :  { %1243 = vsyncmov [#allocation3 + $0x4] }
0x18c3   :  { %s1244_s10 = vpop.sfrf %1243 }
0x18c4   :  { %p1391_p9 = scmp.ne.s32.totalorder %s1244_s10, 0 }
0x18c6   :  { %1248 = shalt.err (%p1391_p9)  }
0x18c7   :  { %1250 = vsyncmov [#allocation3 + $0x5] }
0x18ca   :  { %s1251_s5 = vpop.sfrf %1250 }
0x18cb   :  { %p1392_p10 = scmp.ne.s32.totalorder %s1251_s5, 0 }
0x18cd   :  { %1255 = shalt.err (%p1392_p10)  }
0x18ce   :  { %1257 = vsyncmov [#allocation3 + $0x6] }
0x18d1   :  { %s1258_s11 = vpop.sfrf %1257 }
0x18d2   :  { %p1393_p11 = scmp.ne.s32.totalorder %s1258_s11, 0 }
0x18d4   :  { %1262 = shalt.err (%p1393_p11)  }
0x18d5   :  { %1264 = vsyncmov [#allocation3 + $0x7] }
0x18d8   :  { %s1265_s12 = vpop.sfrf %1264 }
0x18d9   :  { %p1394_p12 = scmp.ne.s32.totalorder %s1265_s12, 0 }
0x18db   :  { %1269 = shalt.err (%p1394_p12)  }

</bundles_post_ra>
